<compile_context>
chip_gen: v6e
topology: v6e:2x2x1
jax: 0.10.0
libtpu: 0.0.40
codegen_flags: <defaults>
</compile_context>

<pallas_src>
from functools import partial

import jax
import jax.numpy as jnp
from jax.experimental import pallas as pl
from jax.experimental.pallas import tpu as pltpu


# ----------------------------- in-kernel helpers -----------------------------


def _mm_bf16(x, w_ref):
    """MXU matmul: bf16 operands, f32 accumulation."""
    return jnp.dot(x.astype(jnp.bfloat16), w_ref[...],
                   preferred_element_type=jnp.float32)


def _bn_relu(h, *, relu, eps=1e-5):
    """Train-mode BatchNorm1d (batch statistics, biased variance) + optional ReLU."""
    n = h.shape[0]
    mean = jnp.sum(h, axis=0, keepdims=True) * (1.0 / n)
    c = h - mean
    var = jnp.sum(c * c, axis=0, keepdims=True) * (1.0 / n)
    h = c * jax.lax.rsqrt(var + eps)
    if relu:
        h = jnp.maximum(h, 0.0)
    return h


def _l2_normalize(h):
    """Row-wise L2 normalize (torch.nn.functional.normalize, dim=1)."""
    ss = jnp.sum(h * h, axis=1, keepdims=True)
    return h * jax.lax.rsqrt(jnp.maximum(ss, 1e-24))


# ------------------------------- Pallas kernels -------------------------------


def _q_branch_kernel(x_ref, wenc_ref, wp0_ref, wp1_ref, wp2_ref,
                     wd0_ref, wd1_ref, q_ref):
    """q = normalize(predictor(projector(encoder(x)))), fully fused in VMEM.

    Grid axis 0 iterates over the two augmented views; x_ref/q_ref carry a
    leading size-1 view block while the weight refs stay resident.
    """
    h = _mm_bf16(x_ref[0], wenc_ref)                        # stand-in encoder
    h = _bn_relu(_mm_bf16(h, wp0_ref), relu=True)           # projector L0
    h = _bn_relu(_mm_bf16(h, wp1_ref), relu=True)           # projector L1
    h = _bn_relu(_mm_bf16(h, wp2_ref), relu=False)          # projector L2 (BN, no affine)
    h = _bn_relu(_mm_bf16(h, wd0_ref), relu=True)           # predictor L0
    h = _bn_relu(_mm_bf16(h, wd1_ref), relu=False)          # predictor L1 (BN, no affine)
    q_ref[0] = _l2_normalize(h).astype(q_ref.dtype)


def _k_branch_kernel(x_ref, wenc_ref, wp0_ref, wp1_ref, wp2_ref, k_ref):
    """k = normalize(momentum_projector(momentum_encoder(x))), fully fused."""
    h = _mm_bf16(x_ref[0], wenc_ref)
    h = _bn_relu(_mm_bf16(h, wp0_ref), relu=True)
    h = _bn_relu(_mm_bf16(h, wp1_ref), relu=True)
    h = _bn_relu(_mm_bf16(h, wp2_ref), relu=False)
    k_ref[0] = _l2_normalize(h).astype(k_ref.dtype)


def _dual_loss_kernel(q_ref, k_ref, qu2_ref, qu1_ref, o_ref,
                      m1_sc, s1_sc, p1_sc, m2_sc, s2_sc, p2_sc, *, inv_t):
    """Sum of two contrastive (softmax CE, label 0) losses, streamed over the
    queue's K axis with an online logsumexp kept in VMEM scratch.

      logits_i = [sum(q_i*k_i), q_i @ queue] / T
      loss     = mean_i(logsumexp(logits_i) - logits_i[0])

    q_ref/k_ref are (2, N, D) stacks of the two views, resident across the
    whole K grid; queue tiles stream per step.
    """
    kt = pl.program_id(0)
    q1 = q_ref[0]
    q2 = q_ref[1]

    @pl.when(kt == 0)
    def _init():
        lp1 = jnp.sum(q1 * k_ref[1], axis=1, keepdims=True) * inv_t
        lp2 = jnp.sum(q2 * k_ref[0], axis=1, keepdims=True) * inv_t
        p1_sc[...] = lp1
        m1_sc[...] = lp1
        s1_sc[...] = jnp.ones_like(lp1)   # exp(l_pos - m) with m == l_pos
        p2_sc[...] = lp2
        m2_sc[...] = lp2
        s2_sc[...] = jnp.ones_like(lp2)

    def _accumulate(q, qu_ref, m_sc, s_sc):
        l_neg = _mm_bf16(q, qu_ref) * inv_t                          # (N, TK)
        m_new = jnp.maximum(m_sc[...], jnp.max(l_neg, axis=1, keepdims=True))
        s_sc[...] = (s_sc[...] * jnp.exp(m_sc[...] - m_new)
                     + jnp.sum(jnp.exp(l_neg - m_new), axis=1, keepdims=True))
        m_sc[...] = m_new

    _accumulate(q1, qu2_ref, m1_sc, s1_sc)   # loss(q1, k2, queue2)
    _accumulate(q2, qu1_ref, m2_sc, s2_sc)   # loss(q2, k1, queue1)

    @pl.when(kt == pl.num_programs(0) - 1)
    def _finalize():
        n_inv = 1.0 / q_ref.shape[1]
        l1 = m1_sc[...] + jnp.log(s1_sc[...]) - p1_sc[...]   # (N, 1)
        l2 = m2_sc[...] + jnp.log(s2_sc[...]) - p2_sc[...]   # (N, 1)
        o_ref[...] = jnp.sum(l1 + l2, axis=0, keepdims=True) * n_inv   # (1, 1)


# ------------------------------- thin wrappers --------------------------------


def _full_spec(shape):
    """Whole-array block that stays resident across the grid (constant index)."""
    nd = len(shape)
    return pl.BlockSpec(shape, lambda *_: (0,) * nd)


def q_branch_apply(x_pair, w_enc, w_proj, w_pred):
    """x_pair: (2, B, F) -> (2, B, dim) normalized query embeddings."""
    v, b, f = x_pair.shape
    dim = w_pred[1].shape[1]
    weights = [w_enc, w_proj[0], w_proj[1], w_proj[2], w_pred[0], w_pred[1]]
    return pl.pallas_call(
        _q_branch_kernel,
        out_shape=jax.ShapeDtypeStruct((v, b, dim), jnp.float32),
        grid_spec=pltpu.PrefetchScalarGridSpec(
            num_scalar_prefetch=0, grid=(v,),
            in_specs=[pl.BlockSpec((1, b, f), lambda i: (i, 0, 0))]
                     + [_full_spec(w.shape) for w in weights],
            out_specs=pl.BlockSpec((1, b, dim), lambda i: (i, 0, 0))),
        compiler_params=pltpu.CompilerParams(
            dimension_semantics=("parallel",)),
    )(x_pair, *weights)


def k_branch_apply(x_pair, w_enc, w_proj):
    """x_pair: (2, B, F) -> (2, B, dim) normalized key embeddings."""
    v, b, f = x_pair.shape
    dim = w_proj[2].shape[1]
    weights = [w_enc, w_proj[0], w_proj[1], w_proj[2]]
    return pl.pallas_call(
        _k_branch_kernel,
        out_shape=jax.ShapeDtypeStruct((v, b, dim), jnp.float32),
        grid_spec=pltpu.PrefetchScalarGridSpec(
            num_scalar_prefetch=0, grid=(v,),
            in_specs=[pl.BlockSpec((1, b, f), lambda i: (i, 0, 0))]
                     + [_full_spec(w.shape) for w in weights],
            out_specs=pl.BlockSpec((1, b, dim), lambda i: (i, 0, 0))),
        compiler_params=pltpu.CompilerParams(
            dimension_semantics=("parallel",)),
    )(x_pair, *weights)


def dual_contrastive_loss(q_pair, k_pair, queue2, queue1, *, temperature, tile_k):
    _, n, dim = q_pair.shape
    k_size = queue1.shape[1]
    assert k_size % tile_k == 0
    kernel = partial(_dual_loss_kernel, inv_t=float(1.0 / temperature))

    resident = lambda kt: (0, 0, 0)   # q/k stacks stay resident across K tiles
    qtile = lambda kt: (0, kt)        # stream queue K tiles

    out = pl.pallas_call(
        kernel,
        out_shape=jax.ShapeDtypeStruct((1, 1), jnp.float32),
        grid_spec=pltpu.PrefetchScalarGridSpec(
            num_scalar_prefetch=0,
            grid=(k_size // tile_k,),
            in_specs=[pl.BlockSpec((2, n, dim), resident),   # q1/q2 stack
                      pl.BlockSpec((2, n, dim), resident),   # k1/k2 stack
                      pl.BlockSpec((dim, tile_k), qtile),    # queue2 tile
                      pl.BlockSpec((dim, tile_k), qtile)],   # queue1 tile
            out_specs=pl.BlockSpec((1, 1), lambda kt: (0, 0)),
            scratch_shapes=[pltpu.VMEM((n, 1), jnp.float32)] * 6),
        compiler_params=pltpu.CompilerParams(
            dimension_semantics=("arbitrary",)),
    )(q_pair, k_pair, queue2, queue1)
    return out[0, 0]


# --------------------------------- MoCo model ---------------------------------


def init_params(key, *, dim, mlp_dim, in_feats, K):
    ks = jax.random.split(key, 8)

    def lin(k, d_in, d_out):
        w = jax.random.normal(k, (d_in, d_out), jnp.float32) / jnp.sqrt(
            jnp.float32(d_in))
        return w.astype(jnp.bfloat16)

    base = {
        "encoder": lin(ks[0], in_feats, dim),
        "projector": [lin(ks[1], dim, mlp_dim),
                      lin(ks[2], mlp_dim, mlp_dim),
                      lin(ks[3], mlp_dim, dim)],
        "predictor": [lin(ks[4], dim, mlp_dim),
                      lin(ks[5], mlp_dim, dim)],
    }
    # momentum encoder / projector initialized as copies of the base ones
    momentum = {"encoder": base["encoder"],
                "projector": list(base["projector"])}

    q1 = jax.random.normal(ks[6], (dim, K), jnp.float32)
    q2 = jax.random.normal(ks[7], (dim, K), jnp.float32)
    q1 = q1 / jnp.maximum(jnp.linalg.norm(q1, axis=0, keepdims=True), 1e-12)
    q2 = q2 / jnp.maximum(jnp.linalg.norm(q2, axis=0, keepdims=True), 1e-12)
    return {"base": base, "momentum": momentum,
            "queue1": q1.astype(jnp.bfloat16),
            "queue2": q2.astype(jnp.bfloat16),
            "queue_ptr": jnp.zeros((), jnp.int32)}


def moco_forward(params, x1, x2, m, *, T, K_queue, TK):
    base = params["base"]
    batch = x1.shape[0]

    # Stack the two augmented views on a leading axis -> one fused kernel per
    # branch with the weights resident in VMEM across both views.
    x_pair = jnp.stack([x1.reshape(batch, -1),
                        x2.reshape(batch, -1)]).astype(jnp.bfloat16)

    # q = normalize(predictor(projector(base_encoder(x))))
    q_pair = q_branch_apply(x_pair, base["encoder"],
                            base["projector"], base["predictor"])

    # momentum update (EMA); numerically a no-op here since momentum == base.
    def ema(wm, wb):
        return (wm.astype(jnp.float32) * m
                + wb.astype(jnp.float32) * (1.0 - m)).astype(wm.dtype)

    mom_enc = ema(params["momentum"]["encoder"], base["encoder"])
    mom_proj = [ema(a, b) for a, b in zip(params["momentum"]["projector"],
                                          base["projector"])]

    # k = normalize(momentum_projector(momentum_encoder(x)))  (no gradient)
    k_pair = jax.lax.stop_gradient(k_branch_apply(x_pair, mom_enc, mom_proj))

    # loss = CE(q1 vs [k2, queue2]) + CE(q2 vs [k1, queue1]) -- single streamed kernel
    loss = dual_contrastive_loss(q_pair, k_pair,
                                 params["queue2"], params["queue1"],
                                 temperature=T, tile_k=TK)

    # dequeue & enqueue (K % batch == 0 asserted at the call site, so no clamp)
    k1, k2 = k_pair[0], k_pair[1]
    ptr = params["queue_ptr"]
    new_q1 = jax.lax.dynamic_update_slice(
        params["queue1"], k1.T.astype(params["queue1"].dtype), (0, ptr))
    new_q2 = jax.lax.dynamic_update_slice(
        params["queue2"], k2.T.astype(params["queue2"].dtype), (0, ptr))
    new_ptr = jnp.mod(ptr + batch, K_queue).astype(jnp.int32)

    new_state = {"queue1": new_q1, "queue2": new_q2, "queue_ptr": new_ptr,
                 "momentum_encoder": mom_enc, "momentum_projector": mom_proj}
    return loss, new_state


# ------------------------------------ main ------------------------------------

if __name__ == "__main__":
    # small synthetic images (NCHW); all feature dims are multiples of 128 and
    # the batch is sublane-aligned (8) for lane-dense MXU/VPU tiles.
    B, C, H, W = 8, 3, 16, 16          # in_feats = 3*16*16 = 768
    DIM = 128                          # feature dim
    MLP_DIM = 256                      # MLP hidden dim
    K_QUEUE = 512                      # queue size
    TEMP = 1.0                         # softmax temperature
    TK = 256                           # queue K-tile streamed by the loss kernel

    assert K_QUEUE % B == 0            # original MoCo requirement (no ptr clamp)
    assert K_QUEUE % TK == 0

    key = jax.random.PRNGKey(0)
    k_params, k_x1, k_x2 = jax.random.split(key, 3)

    params = init_params(k_params, dim=DIM, mlp_dim=MLP_DIM,
                         in_feats=C * H * W, K=K_QUEUE)
    x1 = jax.random.normal(k_x1, (B, C, H, W), jnp.float32)
    x2 = jax.random.normal(k_x2, (B, C, H, W), jnp.float32)
    momentum_m = 0.99

    fwd = jax.jit(partial(moco_forward, T=TEMP, K_queue=K_QUEUE, TK=TK))
    loss, new_state = fwd(params, x1, x2, momentum_m)
    jax.block_until_ready((loss, new_state))

    assert jnp.isfinite(loss), "loss is not finite"
    print("KERNEL_OK")
</pallas_src>

<mosaic_0001>
module attributes {stable_mosaic.version = 11 : i64} {
  func.func @_q_branch_kernel(%arg0: i32, %arg1: memref<1x8x768xbf16, #tpu.memory_space<vmem>>, %arg2: memref<768x128xbf16, #tpu.memory_space<vmem>>, %arg3: memref<128x256xbf16, #tpu.memory_space<vmem>>, %arg4: memref<256x256xbf16, #tpu.memory_space<vmem>>, %arg5: memref<256x128xbf16, #tpu.memory_space<vmem>>, %arg6: memref<128x256xbf16, #tpu.memory_space<vmem>>, %arg7: memref<256x128xbf16, #tpu.memory_space<vmem>>, %arg8: memref<1x8x128xf32, #tpu.memory_space<vmem>>) attributes {dimension_semantics = [#tpu.dimension_semantics<parallel>], iteration_bounds = array<i64: 2>, scalar_prefetch = 0 : i64, scratch_operands = 0 : i64, tpu.core_type = #tpu.core_type<tc>, window_params = [{transform_indices = @transform_0, window_bounds = array<i64: 1, 8, 768>}, {pipeline_mode = #tpu.pipeline_mode<synchronous>, transform_indices = @transform_1, window_bounds = array<i64: 768, 128>}, {pipeline_mode = #tpu.pipeline_mode<synchronous>, transform_indices = @transform_2, window_bounds = array<i64: 128, 256>}, {pipeline_mode = #tpu.pipeline_mode<synchronous>, transform_indices = @transform_3, window_bounds = array<i64: 256, 256>}, {pipeline_mode = #tpu.pipeline_mode<synchronous>, transform_indices = @transform_4, window_bounds = array<i64: 256, 128>}, {pipeline_mode = #tpu.pipeline_mode<synchronous>, transform_indices = @transform_5, window_bounds = array<i64: 128, 256>}, {pipeline_mode = #tpu.pipeline_mode<synchronous>, transform_indices = @transform_6, window_bounds = array<i64: 256, 128>}, {transform_indices = @transform_7, window_bounds = array<i64: 1, 8, 128>}]} {
    %c0 = arith.constant 0 : index
    %c0_0 = arith.constant 0 : index
    %c0_1 = arith.constant 0 : index
    %0 = vector.load %arg1[%c0, %c0_0, %c0_1] : memref<1x8x768xbf16, #tpu.memory_space<vmem>>, vector<1x8x768xbf16>
    %1 = vector.shape_cast %0 : vector<1x8x768xbf16> to vector<8x768xbf16>
    %c0_2 = arith.constant 0 : index
    %c0_3 = arith.constant 0 : index
    %2 = vector.load %arg2[%c0_2, %c0_3] : memref<768x128xbf16, #tpu.memory_space<vmem>>, vector<768x128xbf16>
    %cst = arith.constant dense<0.000000e+00> : vector<8x128xf32>
    %3 = tpu.matmul %1, %2, %cst {dimension_numbers = #tpu.dot_dimension_numbers<[1], [0], [0], [1], [0, 0, 1, 1], [], []>} : vector<8x768xbf16>, vector<768x128xbf16>, vector<8x128xf32> -> vector<8x128xf32>
    %4 = arith.truncf %3 : vector<8x128xf32> to vector<8x128xbf16>
    %c0_4 = arith.constant 0 : index
    %c0_5 = arith.constant 0 : index
    %5 = vector.load %arg3[%c0_4, %c0_5] : memref<128x256xbf16, #tpu.memory_space<vmem>>, vector<128x256xbf16>
    %cst_6 = arith.constant dense<0.000000e+00> : vector<8x256xf32>
    %6 = tpu.matmul %4, %5, %cst_6 {dimension_numbers = #tpu.dot_dimension_numbers<[1], [0], [0], [1], [0, 0, 1, 1], [], []>} : vector<8x128xbf16>, vector<128x256xbf16>, vector<8x256xf32> -> vector<8x256xf32>
    %cst_7 = arith.constant dense<0.000000e+00> : vector<256xf32>
    %7 = vector.multi_reduction <add>, %6, %cst_7 [0] : vector<8x256xf32> to vector<256xf32>
    %8 = vector.shape_cast %7 : vector<256xf32> to vector<1x256xf32>
    %cst_8 = arith.constant 1.250000e-01 : f32
    %9 = vector.broadcast %cst_8 : f32 to vector<1x256xf32>
    %10 = arith.mulf %8, %9 : vector<1x256xf32>
    %11 = vector.broadcast %10 : vector<1x256xf32> to vector<8x256xf32>
    %12 = arith.subf %6, %11 : vector<8x256xf32>
    %13 = arith.mulf %12, %12 : vector<8x256xf32>
    %cst_9 = arith.constant dense<0.000000e+00> : vector<256xf32>
    %14 = vector.multi_reduction <add>, %13, %cst_9 [0] : vector<8x256xf32> to vector<256xf32>
    %15 = vector.shape_cast %14 : vector<256xf32> to vector<1x256xf32>
    %cst_10 = arith.constant 1.250000e-01 : f32
    %16 = vector.broadcast %cst_10 : f32 to vector<1x256xf32>
    %17 = arith.mulf %15, %16 : vector<1x256xf32>
    %cst_11 = arith.constant 9.99999974E-6 : f32
    %18 = vector.broadcast %cst_11 : f32 to vector<1x256xf32>
    %19 = arith.addf %17, %18 : vector<1x256xf32>
    %20 = math.rsqrt %19 : vector<1x256xf32>
    %21 = vector.broadcast %20 : vector<1x256xf32> to vector<8x256xf32>
    %22 = arith.mulf %12, %21 : vector<8x256xf32>
    %cst_12 = arith.constant 0.000000e+00 : f32
    %23 = vector.broadcast %cst_12 : f32 to vector<8x256xf32>
    %24 = arith.maximumf %22, %23 : vector<8x256xf32>
    %25 = arith.truncf %24 : vector<8x256xf32> to vector<8x256xbf16>
    %c0_13 = arith.constant 0 : index
    %c0_14 = arith.constant 0 : index
    %26 = vector.load %arg4[%c0_13, %c0_14] : memref<256x256xbf16, #tpu.memory_space<vmem>>, vector<256x256xbf16>
    %cst_15 = arith.constant dense<0.000000e+00> : vector<8x256xf32>
    %27 = tpu.matmul %25, %26, %cst_15 {dimension_numbers = #tpu.dot_dimension_numbers<[1], [0], [0], [1], [0, 0, 1, 1], [], []>} : vector<8x256xbf16>, vector<256x256xbf16>, vector<8x256xf32> -> vector<8x256xf32>
    %cst_16 = arith.constant dense<0.000000e+00> : vector<256xf32>
    %28 = vector.multi_reduction <add>, %27, %cst_16 [0] : vector<8x256xf32> to vector<256xf32>
    %29 = vector.shape_cast %28 : vector<256xf32> to vector<1x256xf32>
    %cst_17 = arith.constant 1.250000e-01 : f32
    %30 = vector.broadcast %cst_17 : f32 to vector<1x256xf32>
    %31 = arith.mulf %29, %30 : vector<1x256xf32>
    %32 = vector.broadcast %31 : vector<1x256xf32> to vector<8x256xf32>
    %33 = arith.subf %27, %32 : vector<8x256xf32>
    %34 = arith.mulf %33, %33 : vector<8x256xf32>
    %cst_18 = arith.constant dense<0.000000e+00> : vector<256xf32>
    %35 = vector.multi_reduction <add>, %34, %cst_18 [0] : vector<8x256xf32> to vector<256xf32>
    %36 = vector.shape_cast %35 : vector<256xf32> to vector<1x256xf32>
    %cst_19 = arith.constant 1.250000e-01 : f32
    %37 = vector.broadcast %cst_19 : f32 to vector<1x256xf32>
    %38 = arith.mulf %36, %37 : vector<1x256xf32>
    %cst_20 = arith.constant 9.99999974E-6 : f32
    %39 = vector.broadcast %cst_20 : f32 to vector<1x256xf32>
    %40 = arith.addf %38, %39 : vector<1x256xf32>
    %41 = math.rsqrt %40 : vector<1x256xf32>
    %42 = vector.broadcast %41 : vector<1x256xf32> to vector<8x256xf32>
    %43 = arith.mulf %33, %42 : vector<8x256xf32>
    %cst_21 = arith.constant 0.000000e+00 : f32
    %44 = vector.broadcast %cst_21 : f32 to vector<8x256xf32>
    %45 = arith.maximumf %43, %44 : vector<8x256xf32>
    %46 = arith.truncf %45 : vector<8x256xf32> to vector<8x256xbf16>
    %c0_22 = arith.constant 0 : index
    %c0_23 = arith.constant 0 : index
    %47 = vector.load %arg5[%c0_22, %c0_23] : memref<256x128xbf16, #tpu.memory_space<vmem>>, vector<256x128xbf16>
    %cst_24 = arith.constant dense<0.000000e+00> : vector<8x128xf32>
    %48 = tpu.matmul %46, %47, %cst_24 {dimension_numbers = #tpu.dot_dimension_numbers<[1], [0], [0], [1], [0, 0, 1, 1], [], []>} : vector<8x256xbf16>, vector<256x128xbf16>, vector<8x128xf32> -> vector<8x128xf32>
    %cst_25 = arith.constant dense<0.000000e+00> : vector<128xf32>
    %49 = vector.multi_reduction <add>, %48, %cst_25 [0] : vector<8x128xf32> to vector<128xf32>
    %50 = vector.shape_cast %49 : vector<128xf32> to vector<1x128xf32>
    %cst_26 = arith.constant 1.250000e-01 : f32
    %51 = vector.broadcast %cst_26 : f32 to vector<1x128xf32>
    %52 = arith.mulf %50, %51 : vector<1x128xf32>
    %53 = vector.broadcast %52 : vector<1x128xf32> to vector<8x128xf32>
    %54 = arith.subf %48, %53 : vector<8x128xf32>
    %55 = arith.mulf %54, %54 : vector<8x128xf32>
    %cst_27 = arith.constant dense<0.000000e+00> : vector<128xf32>
    %56 = vector.multi_reduction <add>, %55, %cst_27 [0] : vector<8x128xf32> to vector<128xf32>
    %57 = vector.shape_cast %56 : vector<128xf32> to vector<1x128xf32>
    %cst_28 = arith.constant 1.250000e-01 : f32
    %58 = vector.broadcast %cst_28 : f32 to vector<1x128xf32>
    %59 = arith.mulf %57, %58 : vector<1x128xf32>
    %cst_29 = arith.constant 9.99999974E-6 : f32
    %60 = vector.broadcast %cst_29 : f32 to vector<1x128xf32>
    %61 = arith.addf %59, %60 : vector<1x128xf32>
    %62 = math.rsqrt %61 : vector<1x128xf32>
    %63 = vector.broadcast %62 : vector<1x128xf32> to vector<8x128xf32>
    %64 = arith.mulf %54, %63 : vector<8x128xf32>
    %65 = arith.truncf %64 : vector<8x128xf32> to vector<8x128xbf16>
    %c0_30 = arith.constant 0 : index
    %c0_31 = arith.constant 0 : index
    %66 = vector.load %arg6[%c0_30, %c0_31] : memref<128x256xbf16, #tpu.memory_space<vmem>>, vector<128x256xbf16>
    %cst_32 = arith.constant dense<0.000000e+00> : vector<8x256xf32>
    %67 = tpu.matmul %65, %66, %cst_32 {dimension_numbers = #tpu.dot_dimension_numbers<[1], [0], [0], [1], [0, 0, 1, 1], [], []>} : vector<8x128xbf16>, vector<128x256xbf16>, vector<8x256xf32> -> vector<8x256xf32>
    %cst_33 = arith.constant dense<0.000000e+00> : vector<256xf32>
    %68 = vector.multi_reduction <add>, %67, %cst_33 [0] : vector<8x256xf32> to vector<256xf32>
    %69 = vector.shape_cast %68 : vector<256xf32> to vector<1x256xf32>
    %cst_34 = arith.constant 1.250000e-01 : f32
    %70 = vector.broadcast %cst_34 : f32 to vector<1x256xf32>
    %71 = arith.mulf %69, %70 : vector<1x256xf32>
    %72 = vector.broadcast %71 : vector<1x256xf32> to vector<8x256xf32>
    %73 = arith.subf %67, %72 : vector<8x256xf32>
    %74 = arith.mulf %73, %73 : vector<8x256xf32>
    %cst_35 = arith.constant dense<0.000000e+00> : vector<256xf32>
    %75 = vector.multi_reduction <add>, %74, %cst_35 [0] : vector<8x256xf32> to vector<256xf32>
    %76 = vector.shape_cast %75 : vector<256xf32> to vector<1x256xf32>
    %cst_36 = arith.constant 1.250000e-01 : f32
    %77 = vector.broadcast %cst_36 : f32 to vector<1x256xf32>
    %78 = arith.mulf %76, %77 : vector<1x256xf32>
    %cst_37 = arith.constant 9.99999974E-6 : f32
    %79 = vector.broadcast %cst_37 : f32 to vector<1x256xf32>
    %80 = arith.addf %78, %79 : vector<1x256xf32>
    %81 = math.rsqrt %80 : vector<1x256xf32>
    %82 = vector.broadcast %81 : vector<1x256xf32> to vector<8x256xf32>
    %83 = arith.mulf %73, %82 : vector<8x256xf32>
    %cst_38 = arith.constant 0.000000e+00 : f32
    %84 = vector.broadcast %cst_38 : f32 to vector<8x256xf32>
    %85 = arith.maximumf %83, %84 : vector<8x256xf32>
    %86 = arith.truncf %85 : vector<8x256xf32> to vector<8x256xbf16>
    %c0_39 = arith.constant 0 : index
    %c0_40 = arith.constant 0 : index
    %87 = vector.load %arg7[%c0_39, %c0_40] : memref<256x128xbf16, #tpu.memory_space<vmem>>, vector<256x128xbf16>
    %cst_41 = arith.constant dense<0.000000e+00> : vector<8x128xf32>
    %88 = tpu.matmul %86, %87, %cst_41 {dimension_numbers = #tpu.dot_dimension_numbers<[1], [0], [0], [1], [0, 0, 1, 1], [], []>} : vector<8x256xbf16>, vector<256x128xbf16>, vector<8x128xf32> -> vector<8x128xf32>
    %cst_42 = arith.constant dense<0.000000e+00> : vector<128xf32>
    %89 = vector.multi_reduction <add>, %88, %cst_42 [0] : vector<8x128xf32> to vector<128xf32>
    %90 = vector.shape_cast %89 : vector<128xf32> to vector<1x128xf32>
    %cst_43 = arith.constant 1.250000e-01 : f32
    %91 = vector.broadcast %cst_43 : f32 to vector<1x128xf32>
    %92 = arith.mulf %90, %91 : vector<1x128xf32>
    %93 = vector.broadcast %92 : vector<1x128xf32> to vector<8x128xf32>
    %94 = arith.subf %88, %93 : vector<8x128xf32>
    %95 = arith.mulf %94, %94 : vector<8x128xf32>
    %cst_44 = arith.constant dense<0.000000e+00> : vector<128xf32>
    %96 = vector.multi_reduction <add>, %95, %cst_44 [0] : vector<8x128xf32> to vector<128xf32>
    %97 = vector.shape_cast %96 : vector<128xf32> to vector<1x128xf32>
    %cst_45 = arith.constant 1.250000e-01 : f32
    %98 = vector.broadcast %cst_45 : f32 to vector<1x128xf32>
    %99 = arith.mulf %97, %98 : vector<1x128xf32>
    %cst_46 = arith.constant 9.99999974E-6 : f32
    %100 = vector.broadcast %cst_46 : f32 to vector<1x128xf32>
    %101 = arith.addf %99, %100 : vector<1x128xf32>
    %102 = math.rsqrt %101 : vector<1x128xf32>
    %103 = vector.broadcast %102 : vector<1x128xf32> to vector<8x128xf32>
    %104 = arith.mulf %94, %103 : vector<8x128xf32>
    %105 = arith.mulf %104, %104 : vector<8x128xf32>
    %cst_47 = arith.constant dense<0.000000e+00> : vector<8xf32>
    %106 = vector.multi_reduction <add>, %105, %cst_47 [1] : vector<8x128xf32> to vector<8xf32>
    %107 = vector.shape_cast %106 : vector<8xf32> to vector<8x1xf32>
    %cst_48 = arith.constant 1.000000e-24 : f32
    %108 = vector.broadcast %cst_48 : f32 to vector<8x1xf32>
    %109 = arith.maximumf %107, %108 : vector<8x1xf32>
    %110 = math.rsqrt %109 : vector<8x1xf32>
    %111 = vector.broadcast %110 : vector<8x1xf32> to vector<8x128xf32>
    %112 = arith.mulf %104, %111 : vector<8x128xf32>
    %c0_49 = arith.constant 0 : index
    %c0_50 = arith.constant 0 : index
    %c0_51 = arith.constant 0 : index
    %113 = vector.load %arg8[%c0_49, %c0_50, %c0_51] : memref<1x8x128xf32, #tpu.memory_space<vmem>>, vector<1x8x128xf32>
    %114 = vector.shape_cast %113 : vector<1x8x128xf32> to vector<8x128xf32>
    %115 = vector.shape_cast %112 : vector<8x128xf32> to vector<1x8x128xf32>
    tpu.vector_store %arg8[%c0_49, %c0_50, %c0_51], %115 {strides = array<i32>} : memref<1x8x128xf32, #tpu.memory_space<vmem>>, vector<1x8x128xf32>,
    return
  }
  func.func @transform_0(%arg0: i32) -> (i32, i32, i32) {
    %c0_i32 = arith.constant 0 : i32
    %c0_i32_0 = arith.constant 0 : i32
    %c0_i32_1 = arith.constant 0 : i32
    return %arg0, %c0_i32, %c0_i32_0 : i32, i32, i32
  }
  func.func @transform_1(%arg0: i32) -> (i32, i32) {
    %c0_i32 = arith.constant 0 : i32
    %c0_i32_0 = arith.constant 0 : i32
    %c0_i32_1 = arith.constant 0 : i32
    return %c0_i32, %c0_i32_0 : i32, i32
  }
  func.func @transform_2(%arg0: i32) -> (i32, i32) {
    %c0_i32 = arith.constant 0 : i32
    %c0_i32_0 = arith.constant 0 : i32
    %c0_i32_1 = arith.constant 0 : i32
    return %c0_i32, %c0_i32_0 : i32, i32
  }
  func.func @transform_3(%arg0: i32) -> (i32, i32) {
    %c0_i32 = arith.constant 0 : i32
    %c0_i32_0 = arith.constant 0 : i32
    %c0_i32_1 = arith.constant 0 : i32
    return %c0_i32, %c0_i32_0 : i32, i32
  }
  func.func @transform_4(%arg0: i32) -> (i32, i32) {
    %c0_i32 = arith.constant 0 : i32
    %c0_i32_0 = arith.constant 0 : i32
    %c0_i32_1 = arith.constant 0 : i32
    return %c0_i32, %c0_i32_0 : i32, i32
  }
  func.func @transform_5(%arg0: i32) -> (i32, i32) {
    %c0_i32 = arith.constant 0 : i32
    %c0_i32_0 = arith.constant 0 : i32
    %c0_i32_1 = arith.constant 0 : i32
    return %c0_i32, %c0_i32_0 : i32, i32
  }
  func.func @transform_6(%arg0: i32) -> (i32, i32) {
    %c0_i32 = arith.constant 0 : i32
    %c0_i32_0 = arith.constant 0 : i32
    %c0_i32_1 = arith.constant 0 : i32
    return %c0_i32, %c0_i32_0 : i32, i32
  }
  func.func @transform_7(%arg0: i32) -> (i32, i32, i32) {
    %c0_i32 = arith.constant 0 : i32
    %c0_i32_0 = arith.constant 0 : i32
    %c0_i32_1 = arith.constant 0 : i32
    return %arg0, %c0_i32, %c0_i32_0 : i32, i32, i32
  }
}

module attributes {stable_mosaic.version = 11 : i64} {
  func.func @_k_branch_kernel(%arg0: i32, %arg1: memref<1x8x768xbf16, #tpu.memory_space<vmem>>, %arg2: memref<768x128xbf16, #tpu.memory_space<vmem>>, %arg3: memref<128x256xbf16, #tpu.memory_space<vmem>>, %arg4: memref<256x256xbf16, #tpu.memory_space<vmem>>, %arg5: memref<256x128xbf16, #tpu.memory_space<vmem>>, %arg6: memref<1x8x128xf32, #tpu.memory_space<vmem>>) attributes {dimension_semantics = [#tpu.dimension_semantics<parallel>], iteration_bounds = array<i64: 2>, scalar_prefetch = 0 : i64, scratch_operands = 0 : i64, tpu.core_type = #tpu.core_type<tc>, window_params = [{transform_indices = @transform_0, window_bounds = array<i64: 1, 8, 768>}, {pipeline_mode = #tpu.pipeline_mode<synchronous>, transform_indices = @transform_1, window_bounds = array<i64: 768, 128>}, {pipeline_mode = #tpu.pipeline_mode<synchronous>, transform_indices = @transform_2, window_bounds = array<i64: 128, 256>}, {pipeline_mode = #tpu.pipeline_mode<synchronous>, transform_indices = @transform_3, window_bounds = array<i64: 256, 256>}, {pipeline_mode = #tpu.pipeline_mode<synchronous>, transform_indices = @transform_4, window_bounds = array<i64: 256, 128>}, {transform_indices = @transform_5, window_bounds = array<i64: 1, 8, 128>}]} {
    %c0 = arith.constant 0 : index
    %c0_0 = arith.constant 0 : index
    %c0_1 = arith.constant 0 : index
    %0 = vector.load %arg1[%c0, %c0_0, %c0_1] : memref<1x8x768xbf16, #tpu.memory_space<vmem>>, vector<1x8x768xbf16>
    %1 = vector.shape_cast %0 : vector<1x8x768xbf16> to vector<8x768xbf16>
    %c0_2 = arith.constant 0 : index
    %c0_3 = arith.constant 0 : index
    %2 = vector.load %arg2[%c0_2, %c0_3] : memref<768x128xbf16, #tpu.memory_space<vmem>>, vector<768x128xbf16>
    %cst = arith.constant dense<0.000000e+00> : vector<8x128xf32>
    %3 = tpu.matmul %1, %2, %cst {dimension_numbers = #tpu.dot_dimension_numbers<[1], [0], [0], [1], [0, 0, 1, 1], [], []>} : vector<8x768xbf16>, vector<768x128xbf16>, vector<8x128xf32> -> vector<8x128xf32>
    %4 = arith.truncf %3 : vector<8x128xf32> to vector<8x128xbf16>
    %c0_4 = arith.constant 0 : index
    %c0_5 = arith.constant 0 : index
    %5 = vector.load %arg3[%c0_4, %c0_5] : memref<128x256xbf16, #tpu.memory_space<vmem>>, vector<128x256xbf16>
    %cst_6 = arith.constant dense<0.000000e+00> : vector<8x256xf32>
    %6 = tpu.matmul %4, %5, %cst_6 {dimension_numbers = #tpu.dot_dimension_numbers<[1], [0], [0], [1], [0, 0, 1, 1], [], []>} : vector<8x128xbf16>, vector<128x256xbf16>, vector<8x256xf32> -> vector<8x256xf32>
    %cst_7 = arith.constant dense<0.000000e+00> : vector<256xf32>
    %7 = vector.multi_reduction <add>, %6, %cst_7 [0] : vector<8x256xf32> to vector<256xf32>
    %8 = vector.shape_cast %7 : vector<256xf32> to vector<1x256xf32>
    %cst_8 = arith.constant 1.250000e-01 : f32
    %9 = vector.broadcast %cst_8 : f32 to vector<1x256xf32>
    %10 = arith.mulf %8, %9 : vector<1x256xf32>
    %11 = vector.broadcast %10 : vector<1x256xf32> to vector<8x256xf32>
    %12 = arith.subf %6, %11 : vector<8x256xf32>
    %13 = arith.mulf %12, %12 : vector<8x256xf32>
    %cst_9 = arith.constant dense<0.000000e+00> : vector<256xf32>
    %14 = vector.multi_reduction <add>, %13, %cst_9 [0] : vector<8x256xf32> to vector<256xf32>
    %15 = vector.shape_cast %14 : vector<256xf32> to vector<1x256xf32>
    %cst_10 = arith.constant 1.250000e-01 : f32
    %16 = vector.broadcast %cst_10 : f32 to vector<1x256xf32>
    %17 = arith.mulf %15, %16 : vector<1x256xf32>
    %cst_11 = arith.constant 9.99999974E-6 : f32
    %18 = vector.broadcast %cst_11 : f32 to vector<1x256xf32>
    %19 = arith.addf %17, %18 : vector<1x256xf32>
    %20 = math.rsqrt %19 : vector<1x256xf32>
    %21 = vector.broadcast %20 : vector<1x256xf32> to vector<8x256xf32>
    %22 = arith.mulf %12, %21 : vector<8x256xf32>
    %cst_12 = arith.constant 0.000000e+00 : f32
    %23 = vector.broadcast %cst_12 : f32 to vector<8x256xf32>
    %24 = arith.maximumf %22, %23 : vector<8x256xf32>
    %25 = arith.truncf %24 : vector<8x256xf32> to vector<8x256xbf16>
    %c0_13 = arith.constant 0 : index
    %c0_14 = arith.constant 0 : index
    %26 = vector.load %arg4[%c0_13, %c0_14] : memref<256x256xbf16, #tpu.memory_space<vmem>>, vector<256x256xbf16>
    %cst_15 = arith.constant dense<0.000000e+00> : vector<8x256xf32>
    %27 = tpu.matmul %25, %26, %cst_15 {dimension_numbers = #tpu.dot_dimension_numbers<[1], [0], [0], [1], [0, 0, 1, 1], [], []>} : vector<8x256xbf16>, vector<256x256xbf16>, vector<8x256xf32> -> vector<8x256xf32>
    %cst_16 = arith.constant dense<0.000000e+00> : vector<256xf32>
    %28 = vector.multi_reduction <add>, %27, %cst_16 [0] : vector<8x256xf32> to vector<256xf32>
    %29 = vector.shape_cast %28 : vector<256xf32> to vector<1x256xf32>
    %cst_17 = arith.constant 1.250000e-01 : f32
    %30 = vector.broadcast %cst_17 : f32 to vector<1x256xf32>
    %31 = arith.mulf %29, %30 : vector<1x256xf32>
    %32 = vector.broadcast %31 : vector<1x256xf32> to vector<8x256xf32>
    %33 = arith.subf %27, %32 : vector<8x256xf32>
    %34 = arith.mulf %33, %33 : vector<8x256xf32>
    %cst_18 = arith.constant dense<0.000000e+00> : vector<256xf32>
    %35 = vector.multi_reduction <add>, %34, %cst_18 [0] : vector<8x256xf32> to vector<256xf32>
    %36 = vector.shape_cast %35 : vector<256xf32> to vector<1x256xf32>
    %cst_19 = arith.constant 1.250000e-01 : f32
    %37 = vector.broadcast %cst_19 : f32 to vector<1x256xf32>
    %38 = arith.mulf %36, %37 : vector<1x256xf32>
    %cst_20 = arith.constant 9.99999974E-6 : f32
    %39 = vector.broadcast %cst_20 : f32 to vector<1x256xf32>
    %40 = arith.addf %38, %39 : vector<1x256xf32>
    %41 = math.rsqrt %40 : vector<1x256xf32>
    %42 = vector.broadcast %41 : vector<1x256xf32> to vector<8x256xf32>
    %43 = arith.mulf %33, %42 : vector<8x256xf32>
    %cst_21 = arith.constant 0.000000e+00 : f32
    %44 = vector.broadcast %cst_21 : f32 to vector<8x256xf32>
    %45 = arith.maximumf %43, %44 : vector<8x256xf32>
    %46 = arith.truncf %45 : vector<8x256xf32> to vector<8x256xbf16>
    %c0_22 = arith.constant 0 : index
    %c0_23 = arith.constant 0 : index
    %47 = vector.load %arg5[%c0_22, %c0_23] : memref<256x128xbf16, #tpu.memory_space<vmem>>, vector<256x128xbf16>
    %cst_24 = arith.constant dense<0.000000e+00> : vector<8x128xf32>
    %48 = tpu.matmul %46, %47, %cst_24 {dimension_numbers = #tpu.dot_dimension_numbers<[1], [0], [0], [1], [0, 0, 1, 1], [], []>} : vector<8x256xbf16>, vector<256x128xbf16>, vector<8x128xf32> -> vector<8x128xf32>
    %cst_25 = arith.constant dense<0.000000e+00> : vector<128xf32>
    %49 = vector.multi_reduction <add>, %48, %cst_25 [0] : vector<8x128xf32> to vector<128xf32>
    %50 = vector.shape_cast %49 : vector<128xf32> to vector<1x128xf32>
    %cst_26 = arith.constant 1.250000e-01 : f32
    %51 = vector.broadcast %cst_26 : f32 to vector<1x128xf32>
    %52 = arith.mulf %50, %51 : vector<1x128xf32>
    %53 = vector.broadcast %52 : vector<1x128xf32> to vector<8x128xf32>
    %54 = arith.subf %48, %53 : vector<8x128xf32>
    %55 = arith.mulf %54, %54 : vector<8x128xf32>
    %cst_27 = arith.constant dense<0.000000e+00> : vector<128xf32>
    %56 = vector.multi_reduction <add>, %55, %cst_27 [0] : vector<8x128xf32> to vector<128xf32>
    %57 = vector.shape_cast %56 : vector<128xf32> to vector<1x128xf32>
    %cst_28 = arith.constant 1.250000e-01 : f32
    %58 = vector.broadcast %cst_28 : f32 to vector<1x128xf32>
    %59 = arith.mulf %57, %58 : vector<1x128xf32>
    %cst_29 = arith.constant 9.99999974E-6 : f32
    %60 = vector.broadcast %cst_29 : f32 to vector<1x128xf32>
    %61 = arith.addf %59, %60 : vector<1x128xf32>
    %62 = math.rsqrt %61 : vector<1x128xf32>
    %63 = vector.broadcast %62 : vector<1x128xf32> to vector<8x128xf32>
    %64 = arith.mulf %54, %63 : vector<8x128xf32>
    %65 = arith.mulf %64, %64 : vector<8x128xf32>
    %cst_30 = arith.constant dense<0.000000e+00> : vector<8xf32>
    %66 = vector.multi_reduction <add>, %65, %cst_30 [1] : vector<8x128xf32> to vector<8xf32>
    %67 = vector.shape_cast %66 : vector<8xf32> to vector<8x1xf32>
    %cst_31 = arith.constant 1.000000e-24 : f32
    %68 = vector.broadcast %cst_31 : f32 to vector<8x1xf32>
    %69 = arith.maximumf %67, %68 : vector<8x1xf32>
    %70 = math.rsqrt %69 : vector<8x1xf32>
    %71 = vector.broadcast %70 : vector<8x1xf32> to vector<8x128xf32>
    %72 = arith.mulf %64, %71 : vector<8x128xf32>
    %c0_32 = arith.constant 0 : index
    %c0_33 = arith.constant 0 : index
    %c0_34 = arith.constant 0 : index
    %73 = vector.load %arg6[%c0_32, %c0_33, %c0_34] : memref<1x8x128xf32, #tpu.memory_space<vmem>>, vector<1x8x128xf32>
    %74 = vector.shape_cast %73 : vector<1x8x128xf32> to vector<8x128xf32>
    %75 = vector.shape_cast %72 : vector<8x128xf32> to vector<1x8x128xf32>
    tpu.vector_store %arg6[%c0_32, %c0_33, %c0_34], %75 {strides = array<i32>} : memref<1x8x128xf32, #tpu.memory_space<vmem>>, vector<1x8x128xf32>,
    return
  }
  func.func @transform_0(%arg0: i32) -> (i32, i32, i32) {
    %c0_i32 = arith.constant 0 : i32
    %c0_i32_0 = arith.constant 0 : i32
    %c0_i32_1 = arith.constant 0 : i32
    return %arg0, %c0_i32, %c0_i32_0 : i32, i32, i32
  }
  func.func @transform_1(%arg0: i32) -> (i32, i32) {
    %c0_i32 = arith.constant 0 : i32
    %c0_i32_0 = arith.constant 0 : i32
    %c0_i32_1 = arith.constant 0 : i32
    return %c0_i32, %c0_i32_0 : i32, i32
  }
  func.func @transform_2(%arg0: i32) -> (i32, i32) {
    %c0_i32 = arith.constant 0 : i32
    %c0_i32_0 = arith.constant 0 : i32
    %c0_i32_1 = arith.constant 0 : i32
    return %c0_i32, %c0_i32_0 : i32, i32
  }
  func.func @transform_3(%arg0: i32) -> (i32, i32) {
    %c0_i32 = arith.constant 0 : i32
    %c0_i32_0 = arith.constant 0 : i32
    %c0_i32_1 = arith.constant 0 : i32
    return %c0_i32, %c0_i32_0 : i32, i32
  }
  func.func @transform_4(%arg0: i32) -> (i32, i32) {
    %c0_i32 = arith.constant 0 : i32
    %c0_i32_0 = arith.constant 0 : i32
    %c0_i32_1 = arith.constant 0 : i32
    return %c0_i32, %c0_i32_0 : i32, i32
  }
  func.func @transform_5(%arg0: i32) -> (i32, i32, i32) {
    %c0_i32 = arith.constant 0 : i32
    %c0_i32_0 = arith.constant 0 : i32
    %c0_i32_1 = arith.constant 0 : i32
    return %arg0, %c0_i32, %c0_i32_0 : i32, i32, i32
  }
}

module attributes {stable_mosaic.version = 11 : i64} {
  func.func @_dual_loss_kernel(%arg0: i32, %arg1: memref<2x8x128xf32, #tpu.memory_space<vmem>>, %arg2: memref<2x8x128xf32, #tpu.memory_space<vmem>>, %arg3: memref<128x256xbf16, #tpu.memory_space<vmem>>, %arg4: memref<128x256xbf16, #tpu.memory_space<vmem>>, %arg5: memref<1x1xf32, #tpu.memory_space<vmem>>, %arg6: memref<8x1xf32, #tpu.memory_space<vmem>>, %arg7: memref<8x1xf32, #tpu.memory_space<vmem>>, %arg8: memref<8x1xf32, #tpu.memory_space<vmem>>, %arg9: memref<8x1xf32, #tpu.memory_space<vmem>>, %arg10: memref<8x1xf32, #tpu.memory_space<vmem>>, %arg11: memref<8x1xf32, #tpu.memory_space<vmem>>) attributes {dimension_semantics = [#tpu.dimension_semantics<arbitrary>], iteration_bounds = array<i64: 2>, scalar_prefetch = 0 : i64, scratch_operands = 6 : i64, tpu.core_type = #tpu.core_type<tc>, window_params = [{pipeline_mode = #tpu.pipeline_mode<synchronous>, transform_indices = @transform_0, window_bounds = array<i64: 2, 8, 128>}, {pipeline_mode = #tpu.pipeline_mode<synchronous>, transform_indices = @transform_1, window_bounds = array<i64: 2, 8, 128>}, {transform_indices = @transform_2, window_bounds = array<i64: 128, 256>}, {transform_indices = @transform_3, window_bounds = array<i64: 128, 256>}, {pipeline_mode = #tpu.pipeline_mode<synchronous>, transform_indices = @transform_4, window_bounds = array<i64: 1, 1>}]} {
    %c0 = arith.constant 0 : index
    %c0_0 = arith.constant 0 : index
    %c0_1 = arith.constant 0 : index
    %0 = vector.load %arg1[%c0, %c0_0, %c0_1] : memref<2x8x128xf32, #tpu.memory_space<vmem>>, vector<1x8x128xf32>
    %1 = vector.shape_cast %0 : vector<1x8x128xf32> to vector<8x128xf32>
    %c1 = arith.constant 1 : index
    %c0_2 = arith.constant 0 : index
    %c0_3 = arith.constant 0 : index
    %2 = vector.load %arg1[%c1, %c0_2, %c0_3] : memref<2x8x128xf32, #tpu.memory_space<vmem>>, vector<1x8x128xf32>
    %3 = vector.shape_cast %2 : vector<1x8x128xf32> to vector<8x128xf32>
    %c0_i32 = arith.constant 0 : i32
    %4 = arith.cmpi eq, %arg0, %c0_i32 : i32
    %5 = arith.extui %4 : i1 to i32
    %c0_i32_4 = arith.constant 0 : i32
    %6 = arith.cmpi ne, %5, %c0_i32_4 : i32
    scf.if %6 {
      %c1_37 = arith.constant 1 : index
      %c0_38 = arith.constant 0 : index
      %c0_39 = arith.constant 0 : index
      %54 = vector.load %arg2[%c1_37, %c0_38, %c0_39] : memref<2x8x128xf32, #tpu.memory_space<vmem>>, vector<1x8x128xf32>
      %55 = vector.shape_cast %54 : vector<1x8x128xf32> to vector<8x128xf32>
      %56 = arith.mulf %1, %55 : vector<8x128xf32>
      %cst_40 = arith.constant dense<0.000000e+00> : vector<8xf32>
      %57 = vector.multi_reduction <add>, %56, %cst_40 [1] : vector<8x128xf32> to vector<8xf32>
      %58 = vector.shape_cast %57 : vector<8xf32> to vector<8x1xf32>
      %cst_41 = arith.constant 1.000000e+00 : f32
      %59 = vector.broadcast %cst_41 : f32 to vector<8x1xf32>
      %60 = arith.mulf %58, %59 : vector<8x1xf32>
      %c0_42 = arith.constant 0 : index
      %c0_43 = arith.constant 0 : index
      %c0_44 = arith.constant 0 : index
      %61 = vector.load %arg2[%c0_42, %c0_43, %c0_44] : memref<2x8x128xf32, #tpu.memory_space<vmem>>, vector<1x8x128xf32>
      %62 = vector.shape_cast %61 : vector<1x8x128xf32> to vector<8x128xf32>
      %63 = arith.mulf %3, %62 : vector<8x128xf32>
      %cst_45 = arith.constant dense<0.000000e+00> : vector<8xf32>
      %64 = vector.multi_reduction <add>, %63, %cst_45 [1] : vector<8x128xf32> to vector<8xf32>
      %65 = vector.shape_cast %64 : vector<8xf32> to vector<8x1xf32>
      %cst_46 = arith.constant 1.000000e+00 : f32
      %66 = vector.broadcast %cst_46 : f32 to vector<8x1xf32>
      %67 = arith.mulf %65, %66 : vector<8x1xf32>
      %c0_47 = arith.constant 0 : index
      %c0_48 = arith.constant 0 : index
      %68 = vector.load %arg8[%c0_47, %c0_48] : memref<8x1xf32, #tpu.memory_space<vmem>>, vector<8x1xf32>
      tpu.vector_store %arg8[%c0_47, %c0_48], %60 {strides = array<i32>} : memref<8x1xf32, #tpu.memory_space<vmem>>, vector<8x1xf32>,
      %c0_49 = arith.constant 0 : index
      %c0_50 = arith.constant 0 : index
      %69 = vector.load %arg6[%c0_49, %c0_50] : memref<8x1xf32, #tpu.memory_space<vmem>>, vector<8x1xf32>
      tpu.vector_store %arg6[%c0_49, %c0_50], %60 {strides = array<i32>} : memref<8x1xf32, #tpu.memory_space<vmem>>, vector<8x1xf32>,
      %cst_51 = arith.constant 1.000000e+00 : f32
      %70 = vector.broadcast %cst_51 : f32 to vector<8x1xf32>
      %c0_52 = arith.constant 0 : index
      %c0_53 = arith.constant 0 : index
      %71 = vector.load %arg7[%c0_52, %c0_53] : memref<8x1xf32, #tpu.memory_space<vmem>>, vector<8x1xf32>
      tpu.vector_store %arg7[%c0_52, %c0_53], %70 {strides = array<i32>} : memref<8x1xf32, #tpu.memory_space<vmem>>, vector<8x1xf32>,
      %c0_54 = arith.constant 0 : index
      %c0_55 = arith.constant 0 : index
      %72 = vector.load %arg11[%c0_54, %c0_55] : memref<8x1xf32, #tpu.memory_space<vmem>>, vector<8x1xf32>
      tpu.vector_store %arg11[%c0_54, %c0_55], %67 {strides = array<i32>} : memref<8x1xf32, #tpu.memory_space<vmem>>, vector<8x1xf32>,
      %c0_56 = arith.constant 0 : index
      %c0_57 = arith.constant 0 : index
      %73 = vector.load %arg9[%c0_56, %c0_57] : memref<8x1xf32, #tpu.memory_space<vmem>>, vector<8x1xf32>
      tpu.vector_store %arg9[%c0_56, %c0_57], %67 {strides = array<i32>} : memref<8x1xf32, #tpu.memory_space<vmem>>, vector<8x1xf32>,
      %cst_58 = arith.constant 1.000000e+00 : f32
      %74 = vector.broadcast %cst_58 : f32 to vector<8x1xf32>
      %c0_59 = arith.constant 0 : index
      %c0_60 = arith.constant 0 : index
      %75 = vector.load %arg10[%c0_59, %c0_60] : memref<8x1xf32, #tpu.memory_space<vmem>>, vector<8x1xf32>
      tpu.vector_store %arg10[%c0_59, %c0_60], %74 {strides = array<i32>} : memref<8x1xf32, #tpu.memory_space<vmem>>, vector<8x1xf32>,
    } else {
    }
    %7 = arith.truncf %1 : vector<8x128xf32> to vector<8x128xbf16>
    %c0_5 = arith.constant 0 : index
    %c0_6 = arith.constant 0 : index
    %8 = vector.load %arg3[%c0_5, %c0_6] : memref<128x256xbf16, #tpu.memory_space<vmem>>, vector<128x256xbf16>
    %cst = arith.constant dense<0.000000e+00> : vector<8x256xf32>
    %9 = tpu.matmul %7, %8, %cst {dimension_numbers = #tpu.dot_dimension_numbers<[1], [0], [0], [1], [0, 0, 1, 1], [], []>} : vector<8x128xbf16>, vector<128x256xbf16>, vector<8x256xf32> -> vector<8x256xf32>
    %cst_7 = arith.constant 1.000000e+00 : f32
    %10 = vector.broadcast %cst_7 : f32 to vector<8x256xf32>
    %11 = arith.mulf %9, %10 : vector<8x256xf32>
    %c0_8 = arith.constant 0 : index
    %c0_9 = arith.constant 0 : index
    %12 = vector.load %arg6[%c0_8, %c0_9] : memref<8x1xf32, #tpu.memory_space<vmem>>, vector<8x1xf32>
    %cst_10 = arith.constant dense<0xFF800000> : vector<8xf32>
    %13 = vector.multi_reduction <maximumf>, %11, %cst_10 [1] : vector<8x256xf32> to vector<8xf32>
    %14 = vector.shape_cast %13 : vector<8xf32> to vector<8x1xf32>
    %15 = arith.maximumf %12, %14 : vector<8x1xf32>
    %c0_11 = arith.constant 0 : index
    %c0_12 = arith.constant 0 : index
    %16 = vector.load %arg7[%c0_11, %c0_12] : memref<8x1xf32, #tpu.memory_space<vmem>>, vector<8x1xf32>
    %c0_13 = arith.constant 0 : index
    %c0_14 = arith.constant 0 : index
    %17 = vector.load %arg6[%c0_13, %c0_14] : memref<8x1xf32, #tpu.memory_space<vmem>>, vector<8x1xf32>
    %18 = arith.subf %17, %15 : vector<8x1xf32>
    %19 = math.exp %18 : vector<8x1xf32>
    %20 = arith.mulf %16, %19 : vector<8x1xf32>
    %21 = vector.broadcast %15 : vector<8x1xf32> to vector<8x256xf32>
    %22 = arith.subf %11, %21 : vector<8x256xf32>
    %23 = math.exp %22 : vector<8x256xf32>
    %cst_15 = arith.constant dense<0.000000e+00> : vector<8xf32>
    %24 = vector.multi_reduction <add>, %23, %cst_15 [1] : vector<8x256xf32> to vector<8xf32>
    %25 = vector.shape_cast %24 : vector<8xf32> to vector<8x1xf32>
    %26 = arith.addf %20, %25 : vector<8x1xf32>
    %c0_16 = arith.constant 0 : index
    %c0_17 = arith.constant 0 : index
    %27 = vector.load %arg7[%c0_16, %c0_17] : memref<8x1xf32, #tpu.memory_space<vmem>>, vector<8x1xf32>
    tpu.vector_store %arg7[%c0_16, %c0_17], %26 {strides = array<i32>} : memref<8x1xf32, #tpu.memory_space<vmem>>, vector<8x1xf32>,
    %c0_18 = arith.constant 0 : index
    %c0_19 = arith.constant 0 : index
    %28 = vector.load %arg6[%c0_18, %c0_19] : memref<8x1xf32, #tpu.memory_space<vmem>>, vector<8x1xf32>
    tpu.vector_store %arg6[%c0_18, %c0_19], %15 {strides = array<i32>} : memref<8x1xf32, #tpu.memory_space<vmem>>, vector<8x1xf32>,
    %29 = arith.truncf %3 : vector<8x128xf32> to vector<8x128xbf16>
    %c0_20 = arith.constant 0 : index
    %c0_21 = arith.constant 0 : index
    %30 = vector.load %arg4[%c0_20, %c0_21] : memref<128x256xbf16, #tpu.memory_space<vmem>>, vector<128x256xbf16>
    %cst_22 = arith.constant dense<0.000000e+00> : vector<8x256xf32>
    %31 = tpu.matmul %29, %30, %cst_22 {dimension_numbers = #tpu.dot_dimension_numbers<[1], [0], [0], [1], [0, 0, 1, 1], [], []>} : vector<8x128xbf16>, vector<128x256xbf16>, vector<8x256xf32> -> vector<8x256xf32>
    %cst_23 = arith.constant 1.000000e+00 : f32
    %32 = vector.broadcast %cst_23 : f32 to vector<8x256xf32>
    %33 = arith.mulf %31, %32 : vector<8x256xf32>
    %c0_24 = arith.constant 0 : index
    %c0_25 = arith.constant 0 : index
    %34 = vector.load %arg9[%c0_24, %c0_25] : memref<8x1xf32, #tpu.memory_space<vmem>>, vector<8x1xf32>
    %cst_26 = arith.constant dense<0xFF800000> : vector<8xf32>
    %35 = vector.multi_reduction <maximumf>, %33, %cst_26 [1] : vector<8x256xf32> to vector<8xf32>
    %36 = vector.shape_cast %35 : vector<8xf32> to vector<8x1xf32>
    %37 = arith.maximumf %34, %36 : vector<8x1xf32>
    %c0_27 = arith.constant 0 : index
    %c0_28 = arith.constant 0 : index
    %38 = vector.load %arg10[%c0_27, %c0_28] : memref<8x1xf32, #tpu.memory_space<vmem>>, vector<8x1xf32>
    %c0_29 = arith.constant 0 : index
    %c0_30 = arith.constant 0 : index
    %39 = vector.load %arg9[%c0_29, %c0_30] : memref<8x1xf32, #tpu.memory_space<vmem>>, vector<8x1xf32>
    %40 = arith.subf %39, %37 : vector<8x1xf32>
    %41 = math.exp %40 : vector<8x1xf32>
    %42 = arith.mulf %38, %41 : vector<8x1xf32>
    %43 = vector.broadcast %37 : vector<8x1xf32> to vector<8x256xf32>
    %44 = arith.subf %33, %43 : vector<8x256xf32>
    %45 = math.exp %44 : vector<8x256xf32>
    %cst_31 = arith.constant dense<0.000000e+00> : vector<8xf32>
    %46 = vector.multi_reduction <add>, %45, %cst_31 [1] : vector<8x256xf32> to vector<8xf32>
    %47 = vector.shape_cast %46 : vector<8xf32> to vector<8x1xf32>
    %48 = arith.addf %42, %47 : vector<8x1xf32>
    %c0_32 = arith.constant 0 : index
    %c0_33 = arith.constant 0 : index
    %49 = vector.load %arg10[%c0_32, %c0_33] : memref<8x1xf32, #tpu.memory_space<vmem>>, vector<8x1xf32>
    tpu.vector_store %arg10[%c0_32, %c0_33], %48 {strides = array<i32>} : memref<8x1xf32, #tpu.memory_space<vmem>>, vector<8x1xf32>,
    %c0_34 = arith.constant 0 : index
    %c0_35 = arith.constant 0 : index
    %50 = vector.load %arg9[%c0_34, %c0_35] : memref<8x1xf32, #tpu.memory_space<vmem>>, vector<8x1xf32>
    tpu.vector_store %arg9[%c0_34, %c0_35], %37 {strides = array<i32>} : memref<8x1xf32, #tpu.memory_space<vmem>>, vector<8x1xf32>,
    %c1_i32 = arith.constant 1 : i32
    %51 = arith.cmpi eq, %arg0, %c1_i32 : i32
    %52 = arith.extui %51 : i1 to i32
    %c0_i32_36 = arith.constant 0 : i32
    %53 = arith.cmpi ne, %52, %c0_i32_36 : i32
    scf.if %53 {
      %c0_37 = arith.constant 0 : index
      %c0_38 = arith.constant 0 : index
      %54 = vector.load %arg6[%c0_37, %c0_38] : memref<8x1xf32, #tpu.memory_space<vmem>>, vector<8x1xf32>
      %c0_39 = arith.constant 0 : index
      %c0_40 = arith.constant 0 : index
      %55 = vector.load %arg7[%c0_39, %c0_40] : memref<8x1xf32, #tpu.memory_space<vmem>>, vector<8x1xf32>
      %56 = math.log %55 : vector<8x1xf32>
      %57 = arith.addf %54, %56 : vector<8x1xf32>
      %c0_41 = arith.constant 0 : index
      %c0_42 = arith.constant 0 : index
      %58 = vector.load %arg8[%c0_41, %c0_42] : memref<8x1xf32, #tpu.memory_space<vmem>>, vector<8x1xf32>
      %59 = arith.subf %57, %58 : vector<8x1xf32>
      %c0_43 = arith.constant 0 : index
      %c0_44 = arith.constant 0 : index
      %60 = vector.load %arg9[%c0_43, %c0_44] : memref<8x1xf32, #tpu.memory_space<vmem>>, vector<8x1xf32>
      %c0_45 = arith.constant 0 : index
      %c0_46 = arith.constant 0 : index
      %61 = vector.load %arg10[%c0_45, %c0_46] : memref<8x1xf32, #tpu.memory_space<vmem>>, vector<8x1xf32>
      %62 = math.log %61 : vector<8x1xf32>
      %63 = arith.addf %60, %62 : vector<8x1xf32>
      %c0_47 = arith.constant 0 : index
      %c0_48 = arith.constant 0 : index
      %64 = vector.load %arg11[%c0_47, %c0_48] : memref<8x1xf32, #tpu.memory_space<vmem>>, vector<8x1xf32>
      %65 = arith.subf %63, %64 : vector<8x1xf32>
      %66 = arith.addf %59, %65 : vector<8x1xf32>
      %cst_49 = arith.constant dense<0.000000e+00> : vector<1xf32>
      %67 = vector.multi_reduction <add>, %66, %cst_49 [0] : vector<8x1xf32> to vector<1xf32>
      %68 = vector.shape_cast %67 : vector<1xf32> to vector<1x1xf32>
      %cst_50 = arith.constant 1.250000e-01 : f32
      %69 = vector.broadcast %cst_50 : f32 to vector<1x1xf32>
      %70 = arith.mulf %68, %69 : vector<1x1xf32>
      %c0_51 = arith.constant 0 : index
      %c0_52 = arith.constant 0 : index
      %71 = vector.load %arg5[%c0_51, %c0_52] : memref<1x1xf32, #tpu.memory_space<vmem>>, vector<1x1xf32>
      tpu.vector_store %arg5[%c0_51, %c0_52], %70 {strides = array<i32>} : memref<1x1xf32, #tpu.memory_space<vmem>>, vector<1x1xf32>,
    } else {
    }
    return
  }
  func.func @transform_0(%arg0: i32) -> (i32, i32, i32) {
    %c0_i32 = arith.constant 0 : i32
    %c0_i32_0 = arith.constant 0 : i32
    %c0_i32_1 = arith.constant 0 : i32
    %c0_i32_2 = arith.constant 0 : i32
    return %c0_i32, %c0_i32_0, %c0_i32_1 : i32, i32, i32
  }
  func.func @transform_1(%arg0: i32) -> (i32, i32, i32) {
    %c0_i32 = arith.constant 0 : i32
    %c0_i32_0 = arith.constant 0 : i32
    %c0_i32_1 = arith.constant 0 : i32
    %c0_i32_2 = arith.constant 0 : i32
    return %c0_i32, %c0_i32_0, %c0_i32_1 : i32, i32, i32
  }
  func.func @transform_2(%arg0: i32) -> (i32, i32) {
    %c0_i32 = arith.constant 0 : i32
    %c0_i32_0 = arith.constant 0 : i32
    return %c0_i32, %arg0 : i32, i32
  }
  func.func @transform_3(%arg0: i32) -> (i32, i32) {
    %c0_i32 = arith.constant 0 : i32
    %c0_i32_0 = arith.constant 0 : i32
    return %c0_i32, %arg0 : i32, i32
  }
  func.func @transform_4(%arg0: i32) -> (i32, i32) {
    %c0_i32 = arith.constant 0 : i32
    %c0_i32_0 = arith.constant 0 : i32
    %c0_i32_1 = arith.constant 0 : i32
    return %c0_i32, %c0_i32_0 : i32, i32
  }
}

</mosaic_0001>

<bundles_post_ra>
// kernel: moco_forward.5
= control target key start
LH: loop header
LB: loop body
LE: loop exit
PB: predicated region body
PF: predicated region fallthrough
CT: control target
= control target key end

     0   :  { %9 = vsyncpa [#allocation11], 0  ;;  %s1085_s15 = smov 0   ;;  %s1087_s16 = smov 0   ;;  %s1260_s0 = inlined_call_operand.vmem [shape: f32[2,8,128], index: 0, kind: input, shape index: {}]   ;;  %s1261_s1 = inlined_call_operand.vmem [shape: f32[2,8,128], index: 1, kind: input, shape index: {}]   ;;  %s1262_s2 = inlined_call_operand.vmem [shape: bf16[128,512], index: 2, kind: input, shape index: {}]   ;;  %s1263_s3 = inlined_call_operand.vmem [shape: bf16[128,512], index: 3, kind: input, shape index: {}]   ;;  %s1264_s4 = inlined_call_operand.hbm [shape: f32[1,1], index: 4, kind: output, shape index: {}]  }
   0x1   :  { %s1089_s17 = smov 0  }
   0x2 LB: > { %s1101_s18 = sadd.s32 4294967295, %s1055_s17   ;;  %s1104_s19 = sadd.s32 1, %s1055_s17   ;;  %s1055_s17 = sphi %s1089_s17, %s1268_s17   ;;  %s1051_s16 = sphi %s1087_s16, %s1267_s16   ;;  %s1047_s15 = sphi %s1085_s15, %s1266_s15  }
   0x3   : > { %s61_s20 = ssub.s32 %s1055_s17, %s1104_s19  ;;  %s64_s21 = sadd.s32 1, %s1051_s16 }
   0x4   : > { %p62_p0 = scmp.eq.s32.totalorder %s61_s20, 0  ;;  %p71_p1 = scmp.ne.s32.totalorder %s1051_s16, %s1047_s15 }
   0x5   : > { %p72_p2 = scmp.eq.s32.totalorder %s1055_s17, 0  ;;  %p854_p4 = scmp.ge.s32.totalorder %s1055_s17, 2 }
   0x6   : > { %s1113_s22 = scalar_select %p62_p0, %s1051_s16, %s64_s21  }
   0x7   : > { %p1115_p3 = por %p72_p2, %p71_p1  ;;  %150 = sbr.rel (%p854_p4) target bundleno = 36 (0x24), region = 24 }
   0xc   : > { %153 = sbr.rel (!%p1115_p3) target bundleno = 24 (0x18), region = 28  ;;  %s155_s24 = sand.u32 (%p1115_p3), 1, %s1051_s16  }
   0xd   : > { %s904_s25 = sshll.u32 (%p1115_p3), %s1055_s17, 3  ;;  %s855_s26 = sshll.u32 (%p1115_p3), %s155_s24, 7 }
   0xe   : > { %s1127_s29 = scalar_lea.vmem (%p1115_p3), %s1262_s2, %s904_s25  ;;  %s157_s30 = scalar_lea.vmem (%p1115_p3), [#allocation8], %s855_s26 }
   0xf   : > { %v219_v0 = vld [vmem:[%s1127_s29] sm:$0xff] (%p1115_p3)  ;;  %v221_v1 = vld [vmem:[%s1127_s29 + $0x10] sm:$0xff] (%p1115_p3) }
  0x10   : > { %v223_v2 = vld [vmem:[%s1127_s29 + $0x20] sm:$0xff] (%p1115_p3)  ;;  %220 = vst [vmem:[%s157_s30] sm:$0xff] (%p1115_p3), %v219_v0  ;;  %222 = vst [vmem:[%s157_s30 + $0x8] sm:$0xff] (%p1115_p3), %v221_v1  ;;  %v225_v3 = vld [vmem:[%s1127_s29 + $0x30] sm:$0xff] (%p1115_p3) }
  0x11   : > { %224 = vst [vmem:[%s157_s30 + $0x10] sm:$0xff] %v223_v2  ;;  %v227_v4 = vld [vmem:[%s1127_s29 + $0x40] sm:$0xff]  ;;  %v229_v5 = vld [vmem:[%s1127_s29 + $0x50] sm:$0xff]  ;;  %226 = vst [vmem:[%s157_s30 + $0x18] sm:$0xff] %v225_v3 }
  0x12   : > { %228 = vst [vmem:[%s157_s30 + $0x20] sm:$0xff] %v227_v4  ;;  %230 = vst [vmem:[%s157_s30 + $0x28] sm:$0xff] %v229_v5  ;;  %v231_v6 = vld [vmem:[%s1127_s29 + $0x60] sm:$0xff]  ;;  %v233_v7 = vld [vmem:[%s1127_s29 + $0x70] sm:$0xff] }
  0x13   : > { %v235_v8 = vld [vmem:[%s1127_s29 + $0x80] sm:$0xff]  ;;  %232 = vst [vmem:[%s157_s30 + $0x30] sm:$0xff] %v231_v6  ;;  %234 = vst [vmem:[%s157_s30 + $0x38] sm:$0xff] %v233_v7  ;;  %v237_v9 = vld [vmem:[%s1127_s29 + $0x90] sm:$0xff] }
  0x14   : > { %236 = vst [vmem:[%s157_s30 + $0x40] sm:$0xff] %v235_v8  ;;  %v239_v10 = vld [vmem:[%s1127_s29 + $0xa0] sm:$0xff]  ;;  %v241_v11 = vld [vmem:[%s1127_s29 + $0xb0] sm:$0xff]  ;;  %238 = vst [vmem:[%s157_s30 + $0x48] sm:$0xff] %v237_v9 }
  0x15   : > { %240 = vst [vmem:[%s157_s30 + $0x50] sm:$0xff] %v239_v10  ;;  %242 = vst [vmem:[%s157_s30 + $0x58] sm:$0xff] %v241_v11  ;;  %v243_v12 = vld [vmem:[%s1127_s29 + $0xc0] sm:$0xff]  ;;  %v245_v13 = vld [vmem:[%s1127_s29 + $0xd0] sm:$0xff] }
  0x16   : > { %v247_v14 = vld [vmem:[%s1127_s29 + $0xe0] sm:$0xff]  ;;  %244 = vst [vmem:[%s157_s30 + $0x60] sm:$0xff] %v243_v12  ;;  %246 = vst [vmem:[%s157_s30 + $0x68] sm:$0xff] %v245_v13  ;;  %v249_v15 = vld [vmem:[%s1127_s29 + $0xf0] sm:$0xff] }
  0x17   : > { %248 = vst [vmem:[%s157_s30 + $0x70] sm:$0xff] %v247_v14  ;;  %250 = vst [vmem:[%s157_s30 + $0x78] sm:$0xff] %v249_v15 }
  0x18 PF: > { %256 = sbr.rel (!%p1115_p3) target bundleno = 36 (0x24), region = 66  ;;  %s258_s5 = sand.u32 (%p1115_p3), 1, %s1051_s16  }
  0x19   : > { %s905_s6 = sshll.u32 (%p1115_p3), %s1055_s17, 3  ;;  %s858_s7 = sshll.u32 (%p1115_p3), %s258_s5, 7 }
  0x1a   : > { %s1152_s10 = scalar_lea.vmem (%p1115_p3), %s1263_s3, %s905_s6  ;;  %s260_s11 = scalar_lea.vmem (%p1115_p3), [#allocation9], %s858_s7 }
  0x1b   : > { %v322_v16 = vld [vmem:[%s1152_s10] sm:$0xff] (%p1115_p3)  ;;  %v324_v17 = vld [vmem:[%s1152_s10 + $0x10] sm:$0xff] (%p1115_p3) }
  0x1c   : > { %v326_v18 = vld [vmem:[%s1152_s10 + $0x20] sm:$0xff] (%p1115_p3)  ;;  %323 = vst [vmem:[%s260_s11] sm:$0xff] (%p1115_p3), %v322_v16  ;;  %325 = vst [vmem:[%s260_s11 + $0x8] sm:$0xff] (%p1115_p3), %v324_v17  ;;  %v328_v19 = vld [vmem:[%s1152_s10 + $0x30] sm:$0xff] (%p1115_p3) }
  0x1d   : > { %327 = vst [vmem:[%s260_s11 + $0x10] sm:$0xff] %v326_v18  ;;  %v330_v20 = vld [vmem:[%s1152_s10 + $0x40] sm:$0xff]  ;;  %v332_v21 = vld [vmem:[%s1152_s10 + $0x50] sm:$0xff]  ;;  %329 = vst [vmem:[%s260_s11 + $0x18] sm:$0xff] %v328_v19 }
  0x1e   : > { %331 = vst [vmem:[%s260_s11 + $0x20] sm:$0xff] %v330_v20  ;;  %333 = vst [vmem:[%s260_s11 + $0x28] sm:$0xff] %v332_v21  ;;  %v334_v22 = vld [vmem:[%s1152_s10 + $0x60] sm:$0xff]  ;;  %v336_v23 = vld [vmem:[%s1152_s10 + $0x70] sm:$0xff] }
  0x1f   : > { %v338_v24 = vld [vmem:[%s1152_s10 + $0x80] sm:$0xff]  ;;  %335 = vst [vmem:[%s260_s11 + $0x30] sm:$0xff] %v334_v22  ;;  %337 = vst [vmem:[%s260_s11 + $0x38] sm:$0xff] %v336_v23  ;;  %v340_v25 = vld [vmem:[%s1152_s10 + $0x90] sm:$0xff] }
  0x20   : > { %339 = vst [vmem:[%s260_s11 + $0x40] sm:$0xff] %v338_v24  ;;  %v342_v26 = vld [vmem:[%s1152_s10 + $0xa0] sm:$0xff]  ;;  %v344_v27 = vld [vmem:[%s1152_s10 + $0xb0] sm:$0xff]  ;;  %341 = vst [vmem:[%s260_s11 + $0x48] sm:$0xff] %v340_v25 }
  0x21   : > { %343 = vst [vmem:[%s260_s11 + $0x50] sm:$0xff] %v342_v26  ;;  %345 = vst [vmem:[%s260_s11 + $0x58] sm:$0xff] %v344_v27  ;;  %v346_v28 = vld [vmem:[%s1152_s10 + $0xc0] sm:$0xff]  ;;  %v348_v29 = vld [vmem:[%s1152_s10 + $0xd0] sm:$0xff] }
  0x22   : > { %v350_v30 = vld [vmem:[%s1152_s10 + $0xe0] sm:$0xff]  ;;  %347 = vst [vmem:[%s260_s11 + $0x60] sm:$0xff] %v346_v28  ;;  %349 = vst [vmem:[%s260_s11 + $0x68] sm:$0xff] %v348_v29  ;;  %v352_v31 = vld [vmem:[%s1152_s10 + $0xf0] sm:$0xff] }
  0x23   : > { %351 = vst [vmem:[%s260_s11 + $0x70] sm:$0xff] %v350_v30  ;;  %353 = vst [vmem:[%s260_s11 + $0x78] sm:$0xff] %v352_v31 }
  0x24 PF: > { %p861_p5 = scmp.ge.s32.totalorder %s1055_s17, 1  ;;  %p358_p6 = scmp.lt.s32.totalorder %s1055_s17, 3 }
  0x26   : > { %p359_p7 = pnand %p861_p5, %p358_p6 }
  0x27   : > { %s365_s12 = sand.u32 (!%p359_p7), 1, %s1047_s15   ;;  %p865_p8 = scmp.ne.s32.totalorder (!%p359_p7), %s1101_s18, 0 }
  0x28   : > { %362 = sbr.rel (%p359_p7) target bundleno = 918 (0x396), region = 104  ;;  %s862_s23 = sshll.u32 (!%p359_p7), %s365_s12, 7 }
  0x29   : > { %s1183_s24 = scalar_lea.vmem (!%p359_p7), [#allocation8], %s862_s23  ;;  %s1185_s25 = scalar_lea.vmem (!%p359_p7), [#allocation9], %s862_s23 }
  0x2d   : > { %v1176_v32 = vld [vmem:[%s1260_s0] sm:$0xff]  ;;  %v1181_v33 = vld [vmem:[%s1260_s0 + $0x8] sm:$0xff]  ;;  %405 = sbr.rel (%p865_p8) target bundleno = 196 (0xc4), region = 116 }
  0x32   : > { %v866_v34 = vld [vmem:[%s1261_s1 + $0x8] sm:$0xff]  ;;  %v411_v35 = vld [vmem:[%s1261_s1] sm:$0xff]  ;;  %vm415_vm0 = vcmask 7168   ;;  %v1057_v37 = vmov 1.0  }
  0x33   : > { %v408_v36 = vmul.f32 %v866_v34, %v1176_v32  ;;  %418 = vst.msk [vmem:[#allocation3] sm:$0xff] %vm415_vm0, %v1057_v37  ;;  %421 = vst.msk [vmem:[#allocation6] sm:$0xff] %vm415_vm0, %v1057_v37  ;;  %v412_v38 = vmul.f32 %v1181_v33, %v411_v35 }
  0x35   : > { %409 = vadd.xlane.f32.xlu0 %v408_v36 }
  0x39   : > { %413 = vadd.xlane.f32.xlu0 %v412_v38 }
  0xbe   : > { %v410_v39 = vpop.xlane.xlu0 %409 }
  0xbf   : > { %416 = vst.msk [vmem:[#allocation4] sm:$0xff] %vm415_vm0, %v410_v39  ;;  %417 = vst.msk [vmem:[#allocation2] sm:$0xff] %vm415_vm0, %v410_v39 }
  0xc2   : > { %v414_v40 = vpop.xlane.xlu0 %413 }
  0xc3   : > { %419 = vst.msk [vmem:[#allocation7] sm:$0xff] %vm415_vm0, %v414_v40  ;;  %420 = vst.msk [vmem:[#allocation5] sm:$0xff] %vm415_vm0, %v414_v40 }
  0xc4 PF: > { %v941_v41 = vld [vmem:[%s1183_s24 + $0x74] ss:$8 sps:$4 sm:$0xff]   ;;  %v1058_v43 = vmov 0   ;;  %v945_v44 = vld [vmem:[%s1183_s24 + $0x70] ss:$8 sps:$4 sm:$0xff]   ;;  %v422_v10 = vpack.c.bf16 %v1176_v32, %v1176_v32  ;;  %v588_v11 = vpack.c.bf16 %v1181_v33, %v1181_v33  ;;  %vm585_vm1 = vcmask 7168  }
  0xc5   : > { %v943_v42 = vld [vmem:[%s1185_s25 + $0x74] ss:$8 sps:$4 sm:$0xff]   ;;  %551 = vmatprep.mubr.bf16.mxu0 %v1058_v43  ;;  %717 = vmatprep.mubr.bf16.mxu1 %v1058_v43  ;;  %v946_v45 = vld [vmem:[%s1185_s25 + $0x70] ss:$8 sps:$4 sm:$0xff]   ;;  %v947_v46 = vld [vmem:[%s1183_s24 + $0x64] ss:$8 sps:$4 sm:$0xff]  }
  0xc6   : > { %519 = vmatprep.subr.bf16.mxu0 %v941_v41  ;;  %939 = vset.pattern.permute.xlu1 %v1058_v43  ;;  %v949_v47 = vld [vmem:[%s1185_s25 + $0x64] ss:$8 sps:$4 sm:$0xff]   ;;  %v951_v48 = vld [vmem:[%s1183_s24 + $0x60] ss:$8 sps:$4 sm:$0xff]   ;;  %v953_v50 = vld [vmem:[%s1183_s24 + $0x54] ss:$8 sps:$4 sm:$0xff]  }
  0xc7   : > { %685 = vmatprep.subr.bf16.mxu1 %v943_v42  ;;  %940 = vset.pattern.permute.xlu0 %v1058_v43  ;;  %v952_v49 = vld [vmem:[%s1185_s25 + $0x60] ss:$8 sps:$4 sm:$0xff]   ;;  %v955_v51 = vld [vmem:[%s1185_s25 + $0x54] ss:$8 sps:$4 sm:$0xff]   ;;  %v957_v52 = vld [vmem:[%s1183_s24 + $0x50] ss:$8 sps:$4 sm:$0xff]  }
  0xc8   : > { %520 = vmatpush1.bf16.msra.mxu0 %v945_v44  ;;  %686 = vmatpush1.bf16.msra.mxu1 %v946_v45  ;;  %v958_v53 = vld [vmem:[%s1185_s25 + $0x50] ss:$8 sps:$4 sm:$0xff]   ;;  %v959_v54 = vld [vmem:[%s1183_s24 + $0x44] ss:$8 sps:$4 sm:$0xff]   ;;  %v963_v56 = vld [vmem:[%s1183_s24 + $0x40] ss:$8 sps:$4 sm:$0xff]  }
  0xc9   : > { %521 = vmatprep.subr.bf16.mxu0 %v947_v46  ;;  %687 = vmatprep.subr.bf16.mxu1 %v949_v47  ;;  %v961_v55 = vld [vmem:[%s1185_s25 + $0x44] ss:$8 sps:$4 sm:$0xff]   ;;  %v964_v57 = vld [vmem:[%s1185_s25 + $0x40] ss:$8 sps:$4 sm:$0xff]   ;;  %v965_v58 = vld [vmem:[%s1183_s24 + $0x34] ss:$8 sps:$4 sm:$0xff]  }
  0xca   : > { %v967_v59 = vld [vmem:[%s1185_s25 + $0x34] ss:$8 sps:$4 sm:$0xff]   ;;  %v969_v60 = vld [vmem:[%s1183_s24 + $0x30] ss:$8 sps:$4 sm:$0xff]   ;;  %v971_v62 = vld [vmem:[%s1183_s24 + $0x24] ss:$8 sps:$4 sm:$0xff]  }
  0xcb   : > { %v970_v61 = vld [vmem:[%s1185_s25 + $0x30] ss:$8 sps:$4 sm:$0xff]   ;;  %v973_v63 = vld [vmem:[%s1185_s25 + $0x24] ss:$8 sps:$4 sm:$0xff]   ;;  %v975_v0 = vld [vmem:[%s1183_s24 + $0x20] ss:$8 sps:$4 sm:$0xff]  }
  0xcc   : > { %522 = vmatpush1.bf16.msra.mxu0 %v951_v48  ;;  %688 = vmatpush1.bf16.msra.mxu1 %v952_v49  ;;  %v976_v1 = vld [vmem:[%s1185_s25 + $0x20] ss:$8 sps:$4 sm:$0xff]   ;;  %v977_v2 = vld [vmem:[%s1183_s24 + $0x14] ss:$8 sps:$4 sm:$0xff]   ;;  %v981_v4 = vld [vmem:[%s1183_s24 + $0x10] ss:$8 sps:$4 sm:$0xff]  }
  0xcd   : > { %523 = vmatprep.subr.bf16.mxu0 %v953_v50  ;;  %689 = vmatprep.subr.bf16.mxu1 %v955_v51  ;;  %v979_v3 = vld [vmem:[%s1185_s25 + $0x14] ss:$8 sps:$4 sm:$0xff]   ;;  %v982_v5 = vld [vmem:[%s1185_s25 + $0x10] ss:$8 sps:$4 sm:$0xff]   ;;  %v983_v6 = vld [vmem:[%s1183_s24 + $0x4] ss:$8 sps:$4 sm:$0xff]  }
  0xce   : > { %v985_v7 = vld [vmem:[%s1185_s25 + $0x4] ss:$8 sps:$4 sm:$0xff]   ;;  %v987_v8 = vld [vmem:[%s1183_s24] ss:$8 sps:$4 sm:$0xff]   ;;  %v560_v22 = vld [vmem:[#allocation2] sm:$0xff]  ;;  %p899_p9 = scmp.ne.s32.totalorder %s1101_s18, 1 }
  0xcf   : > { %v988_v9 = vld [vmem:[%s1185_s25] ss:$8 sps:$4 sm:$0xff]   ;;  %v565_v49 = vld [vmem:[#allocation3] sm:$0xff] }
  0xd0   : > { %524 = vmatpush1.bf16.msra.mxu0 %v957_v52  ;;  %690 = vmatpush1.bf16.msra.mxu1 %v958_v53  ;;  %v726_v25 = vld [vmem:[#allocation5] sm:$0xff]  ;;  %v731_v53 = vld [vmem:[#allocation6] sm:$0xff] }
  0xd1   : > { %525 = vmatprep.subr.bf16.mxu0 %v959_v54  ;;  %691 = vmatprep.subr.bf16.mxu1 %v961_v55 }
  0xd4   : > { %526 = vmatpush1.bf16.msra.mxu0 %v963_v56  ;;  %692 = vmatpush1.bf16.msra.mxu1 %v964_v57 }
  0xd5   : > { %527 = vmatprep.subr.bf16.mxu0 %v965_v58  ;;  %693 = vmatprep.subr.bf16.mxu1 %v967_v59 }
  0xd8   : > { %528 = vmatpush1.bf16.msra.mxu0 %v969_v60  ;;  %694 = vmatpush1.bf16.msra.mxu1 %v970_v61 }
  0xd9   : > { %529 = vmatprep.subr.bf16.mxu0 %v971_v62  ;;  %695 = vmatprep.subr.bf16.mxu1 %v973_v63 }
  0xdc   : > { %530 = vmatpush1.bf16.msra.mxu0 %v975_v0  ;;  %696 = vmatpush1.bf16.msra.mxu1 %v976_v1 }
  0xdd   : > { %531 = vmatprep.subr.bf16.mxu0 %v977_v2  ;;  %697 = vmatprep.subr.bf16.mxu1 %v979_v3 }
  0xe0   : > { %532 = vmatpush1.bf16.msra.mxu0 %v981_v4  ;;  %698 = vmatpush1.bf16.msra.mxu1 %v982_v5 }
  0xe1   : > { %533 = vmatprep.subr.bf16.mxu0 %v983_v6  ;;  %699 = vmatprep.subr.bf16.mxu1 %v985_v7 }
  0xe4   : > { %534 = vmatpush1.bf16.msra.mxu0 %v987_v8  ;;  %700 = vmatpush1.bf16.msra.mxu1 %v988_v9 }
  0xe7   : > { %552 = vmatmul.mubr.bf16.vlgmr.msra.gmra.mxu0 %v422_v10  ;;  %718 = vmatmul.mubr.bf16.vlgmr.msra.gmra.mxu1 %v588_v11 }
 0x1a7   : > { %v553_v12 = vpop.f32.mrf.mxu0  ;;  %v719_v13 = vpop.f32.mrf.mxu1 }
 0x1a9   : > { %v555_v14 = vpop.f32.mrf.mxu0  ;;  %v721_v15 = vpop.f32.mrf.mxu1 }
 0x1aa   : > { %v561_v16 = vmax.f32 %v553_v12, %v555_v14  ;;  %v727_v21 = vmax.f32 %v719_v13, %v721_v15 }
 0x1ab   : > { %v557_v17 = vpop.f32.mrf.mxu0  ;;  %v723_v18 = vpop.f32.mrf.mxu1 }
 0x1ac   : > { %562 = vmax.xlane.f32.xlu0 %v561_v16 }
 0x1ad   : > { %v558_v19 = vpop.f32.mrf.mxu0  ;;  %v724_v20 = vpop.f32.mrf.mxu1 }
 0x1b0   : > { %728 = vmax.xlane.f32.xlu0 %v727_v21 }
 0x235   : > { %v563_v23 = vpop.xlane.xlu0 %562 }
 0x236   : > { %v564_v24 = vmax.f32 %v560_v22, %v563_v23 }
 0x238   : > { %v566_v26 = vsub.f32 %v560_v22, %v564_v24  ;;  %587 = vst.msk [vmem:[#allocation2] sm:$0xff] %vm585_vm1, %v564_v24  ;;  %572 = vperm.xlu1 %939, %v564_v24  }
 0x239   : > { %v729_v27 = vpop.xlane.xlu0 %728 }
 0x23a   : > { %v730_v28 = vmax.f32 %v726_v25, %v729_v27  ;;  %v567_v46 = vmul.f32 1.442695, %v566_v26 }
 0x23c   : > { %v732_v29 = vsub.f32 %v726_v25, %v730_v28  ;;  %752 = vst.msk [vmem:[#allocation5] sm:$0xff] %vm585_vm1, %v730_v28  ;;  %738 = vperm.xlu1 %939, %v730_v28  }
 0x23e   : > { %v733_v47 = vmul.f32 1.442695, %v732_v29 }
 0x2b3   : > { %v573_v30 = vpop.permute.xlu1 %572 }
 0x2b4   : > { %v575_v31 = vsub.f32 %v553_v12, %v573_v30  ;;  %v576_v32 = vsub.f32 %v555_v14, %v573_v30 }
 0x2b6   : > { %v577_v33 = vmul.f32 1.442695, %v575_v31  ;;  %v579_v34 = vmul.f32 1.442695, %v576_v32 }
 0x2b7   : > { %v739_v35 = vpop.permute.xlu1 %738 }
 0x2b8   : > { %989 = vpow2.f32 %v577_v33  ;;  %v741_v36 = vsub.f32 %v719_v13, %v739_v35  ;;  %v742_v37 = vsub.f32 %v721_v15, %v739_v35 }
 0x2b9   : > { %991 = vpow2.f32 %v579_v34 }
 0x2ba   : > { %v743_v38 = vmul.f32 1.442695, %v741_v36  ;;  %v745_v39 = vmul.f32 1.442695, %v742_v37 }
 0x2bc   : > { %993 = vpow2.f32 %v743_v38 }
 0x2bd   : > { %995 = vpow2.f32 %v745_v39 }
 0x2be   : > { %997 = vpow2.f32 %v567_v46 }
 0x2bf   : > { %999 = vpow2.f32 %v733_v47 }
 0x2c5   : > { %v990_v40 = vpop.eup %989 }
 0x2c6   : > { %v992_v41 = vpop.eup %991 }
 0x2c7   : > { %v581_v42 = vadd.f32 %v992_v41, %v990_v40 }
 0x2c9   : > { %v994_v43 = vpop.eup %993  ;;  %582 = vadd.xlane.f32.xlu0 %v581_v42 }
 0x2ca   : > { %v996_v44 = vpop.eup %995 }
 0x2cb   : > { %v747_v45 = vadd.f32 %v996_v44, %v994_v43  ;;  %v998_v48 = vpop.eup %997 }
 0x2cc   : > { %v569_v50 = vmul.f32 %v998_v48, %v565_v49  ;;  %v1000_v51 = vpop.eup %999 }
 0x2cd   : > { %748 = vadd.xlane.f32.xlu1 %v747_v45  ;;  %v735_v55 = vmul.f32 %v1000_v51, %v731_v53 }
 0x352   : > { %v583_v52 = vpop.xlane.xlu0 %582 }
 0x353   : > { %v584_v54 = vadd.f32 %v583_v52, %v569_v50 }
 0x355   : > { %586 = vst.msk [vmem:[#allocation3] sm:$0xff] %vm585_vm1, %v584_v54  ;;  %756 = sbr.rel (%p899_p9) target bundleno = 903 (0x387), region = 120 }
 0x356   : > { %v749_v56 = vpop.xlane.xlu1 %748 }
 0x357   : > { %v750_v57 = vadd.f32 %v749_v56, %v735_v55 }
 0x359   : > { %751 = vst.msk [vmem:[#allocation6] sm:$0xff] %vm585_vm1, %v750_v57 }
 0x35a   : > { %v757_v61 = vld [vmem:[#allocation2] sm:$0xff]  ;;  %v764_v0 = vld [vmem:[#allocation5] sm:$0xff]  ;;  %v762_v1 = vld [vmem:[#allocation4] sm:$0xff]  ;;  %vm780_vm2 = vcmask 0  }
 0x35b   : > { %v769_v4 = vld [vmem:[#allocation7] sm:$0xff] }
 0x35c   : > { %v758_v58 = vld [vmem:[#allocation3] sm:$0xff] }
 0x35d   : > { %1001 = vlog2.f32 %v758_v58 }
 0x360   : > { %v765_v59 = vld [vmem:[#allocation6] sm:$0xff] }
 0x361   : > { %1003 = vlog2.f32 %v765_v59 }
 0x36a   : > { %v1002_v60 = vpop.eup %1001 }
 0x36b   : > { %v760_v63 = vmul.f32 0.6931472, %v1002_v60 }
 0x36d   : > { %v761_v3 = vadd.f32 %v760_v63, %v757_v61 }
 0x36e   : > { %v1004_v62 = vpop.eup %1003 }
 0x36f   : > { %v767_v2 = vmul.f32 0.6931472, %v1004_v62  ;;  %v763_v6 = vsub.f32 %v761_v3, %v762_v1 }
 0x371   : > { %v768_v5 = vadd.f32 %v767_v2, %v764_v0 }
 0x373   : > { %v770_v7 = vsub.f32 %v768_v5, %v769_v4 }
 0x375   : > { %v771_v8 = vadd.f32 %v770_v7, %v763_v6 }
 0x377   : > { %v772_v9 = vsel %vm585_vm1, %v771_v8, 0.0 }
 0x378   : > { %v773_v10 = vrot.slane %v772_v9, 4 }
 0x37a   : > { %v774_v11 = vadd.f32 %v773_v10, %v772_v9 }
 0x37c   : > { %v775_v12 = vrot.slane %v774_v11, 2 }
 0x37e   : > { %v776_v13 = vadd.f32 %v775_v12, %v774_v11 }
 0x380   : > { %v777_v14 = vrot.slane %v776_v13, 1 }
 0x382   : > { %v778_v15 = vadd.f32 %v777_v14, %v776_v13 }
 0x384   : > { %v779_v16 = vmul.f32 0.125, %v778_v15 }
 0x386   : > { %781 = vst.msk [vmem:[#allocation10] sm:$0x1] %vm780_vm2, %v779_v16 }
 0x387 PF: > { %p910_p10 = scmp.eq.s32.totalorder %s1101_s18, 1  ;;  %s1059_s28 = smov [#allocation10]  }
 0x388   : > { %s789_s29 = sshll.u32 %s1059_s28, 4  ;;  %s790_s29 = int_to_ptr.vmem [resolvable:$true] %s789_s29 }
 0x389   : > { %s1005_s30 = scalar_lea.vmem %s790_s29, 16  ;;  %s1011_s5 = scalar_lea.vmem %s790_s29, 32 }
 0x38a   : > { %p1006_p11 = scmp.ne.s32.totalorder %s790_s29, %s1005_s30  ;;  %p1012_p0 = scmp.lt.s32.totalorder %s790_s29, %s790_s29 }
 0x38b   : > { %p1013_p1 = scmp.lt.s32.totalorder %s1011_s5, %s1005_s30 }
 0x38c   : > { %p1007_p12 = pnand %p1006_p11, %p910_p10 }
 0x38d   : > { %p1014_p2 = por %p1013_p1, %p1012_p0 }
 0x38e   : > { %p1008_p13 = pneg %p1007_p12 }
 0x390   : > { %p1015_p3 = pnand %p1014_p2, %p1008_p13 }
 0x392   : > { %1018 = shalt.err (!%p1015_p3)
}
 0x393   : > { %907 = dma.vmem_to_hbm [thread:$0]  (%p910_p10), %s790_s29, 16, %s1264_s4, [#allocation11]  }
 0x394   : > { %1042 = dma.done.wait (%p910_p10), [#allocation11], 16  }
 0x395   : > { %1044 = vsyncadd (%p910_p10), [#allocation11], 4294967280 }
 0x396 PF: > { %p12_p4 = scmp.ge.s32.totalorder %s1104_s19, 4   ;;  %s1266_s15 = smov %s1051_s16 }
 0x397   : > { %s1267_s16 = smov %s1113_s22  ;;  %s1268_s17 = smov %s1104_s19 }
 0x398   :  { %14 = sbr.rel (!%p12_p4) target bundleno = 2 (0x2), region = 162 }
 0x39d   :  { %802 = vsyncpa [#allocation11], 1 }
 0x39e   :  { %804 = vsyncpa [#allocation11 + $0x1], 1 }

// kernel: moco_forward.4
= control target key start
LH: loop header
LB: loop body
LE: loop exit
PB: predicated region body
PF: predicated region fallthrough
CT: control target
= control target key end

     0   :  { %s1872_s18 = smov 0   ;;  %s2238_s0 = inlined_call_operand.vmem [shape: bf16[2,8,768], index: 0, kind: input, shape index: {}]   ;;  %s2239_s1 = inlined_call_operand.vmem [shape: bf16[768,128], index: 1, kind: input, shape index: {}]   ;;  %s2240_s2 = inlined_call_operand.vmem [shape: bf16[128,256], index: 2, kind: input, shape index: {}]   ;;  %s2241_s3 = inlined_call_operand.vmem [shape: bf16[256,256], index: 3, kind: input, shape index: {}]   ;;  %s2242_s4 = inlined_call_operand.vmem [shape: bf16[256,128], index: 4, kind: input, shape index: {}]   ;;  %s2243_s5 = inlined_call_operand.vmem [shape: f32[2,8,128], index: 5, kind: output, shape index: {}]  }
   0x1 LB: > { %s1454_s19 = sadd.s32 4294967295, %s1839_s18   ;;  %p1458_p0 = scmp.ge.s32.totalorder %s1839_s18, 1  ;;  %s1839_s18 = sphi %s1872_s18, %s15_s18  }
   0x2   : > { %p187_p1 = scmp.lt.s32.totalorder %s1839_s18, 3 }
   0x4   : > { %p188_p2 = pnand %p1458_p0, %p187_p1 }
   0x5   : > { %p214_p3 = scmp.lt.s32.totalorder (!%p188_p2), %s1454_s19, 1 }
   0x6   : > { %191 = sbr.rel (%p188_p2) target bundleno = 1184 (0x4a0), region = 40 }
   0xb   : > { %v1679_v0 = vld [vmem:[%s2239_s1 + $0x78] sm:$0xff]   ;;  %v1683_v4 = vld [vmem:[%s2239_s1 + $0x70] sm:$0xff]   ;;  %v1687_v8 = vld [vmem:[%s2239_s1 + $0x68] sm:$0xff]   ;;  %s2245_s19 = smov (!%p214_p3, %s1454_s19), 1 }
   0xc   : > { %v1680_v1 = vld [vmem:[%s2239_s1 + $0xf8] sm:$0xff]   ;;  %1581 = vmatprep.subr.bf16.mxu0 %v1679_v0  ;;  %v1684_v5 = vld [vmem:[%s2239_s1 + $0xf0] sm:$0xff]   ;;  %v1688_v9 = vld [vmem:[%s2239_s1 + $0xe8] sm:$0xff]   ;;  %s1669_s26 = smul.u32 24, %s2245_s19  ;;  %s1460_s17 = sshll.u32 %s2245_s19, 3 }
   0xd   : > { %v1681_v2 = vld [vmem:[%s2239_s1 + $0x38] sm:$0xff]   ;;  %1603 = vmatprep.subr.bf16.mxu1 %v1680_v1  ;;  %v1685_v6 = vld [vmem:[%s2239_s1 + $0x30] sm:$0xff]   ;;  %v1689_v10 = vld [vmem:[%s2239_s1 + $0x28] sm:$0xff]   ;;  %s222_s22 = scalar_lea.vmem %s2243_s5, %s1460_s17 }
   0xe   : > { %v1682_v3 = vld [vmem:[%s2239_s1 + $0xb8] sm:$0xff]   ;;  %1582 = vmatpush3.bf16.msra.mxu0 %v1681_v2  ;;  %v1686_v7 = vld [vmem:[%s2239_s1 + $0xb0] sm:$0xff]   ;;  %v1690_v11 = vld [vmem:[%s2239_s1 + $0xa8] sm:$0xff]   ;;  %s1980_s12 = scalar_lea.vmem %s2238_s0, %s1669_s26 }
   0xf   : > { %1604 = vmatpush3.bf16.msra.mxu1 %v1682_v3  ;;  %1583 = vmatprep.subr.bf16.mxu0 %v1683_v4  ;;  %v1691_v12 = vld [vmem:[%s2239_s1 + $0x60] sm:$0xff]   ;;  %v1695_v16 = vld [vmem:[%s2239_s1 + $0x58] sm:$0xff]   ;;  %v1699_v20 = vld [vmem:[%s2239_s1 + $0x50] sm:$0xff]  }
  0x10   : > { %1605 = vmatprep.subr.bf16.mxu1 %v1684_v5  ;;  %v1692_v13 = vld [vmem:[%s2239_s1 + $0xe0] sm:$0xff]   ;;  %v1696_v17 = vld [vmem:[%s2239_s1 + $0xd8] sm:$0xff]   ;;  %v1700_v21 = vld [vmem:[%s2239_s1 + $0xd0] sm:$0xff]  }
  0x11   : > { %v1693_v14 = vld [vmem:[%s2239_s1 + $0x20] sm:$0xff]   ;;  %v1697_v18 = vld [vmem:[%s2239_s1 + $0x18] sm:$0xff]   ;;  %v1701_v22 = vld [vmem:[%s2239_s1 + $0x10] sm:$0xff]  }
  0x12   : > { %1584 = vmatpush3.bf16.msra.mxu0 %v1685_v6  ;;  %v1694_v15 = vld [vmem:[%s2239_s1 + $0xa0] sm:$0xff]   ;;  %v1698_v19 = vld [vmem:[%s2239_s1 + $0x98] sm:$0xff]   ;;  %v1702_v23 = vld [vmem:[%s2239_s1 + $0x90] sm:$0xff]  }
  0x13   : > { %1606 = vmatpush3.bf16.msra.mxu1 %v1686_v7  ;;  %1585 = vmatprep.subr.bf16.mxu0 %v1687_v8  ;;  %v1703_v24 = vld [vmem:[%s2239_s1 + $0x48] sm:$0xff]   ;;  %v1707_v28 = vld [vmem:[%s2239_s1 + $0x40] sm:$0xff]   ;;  %v1715_v38 = vld [vmem:[%s2239_s1 + $0x178] sm:$0xff]  }
  0x14   : > { %1607 = vmatprep.subr.bf16.mxu1 %v1688_v9  ;;  %v1704_v25 = vld [vmem:[%s2239_s1 + $0xc8] sm:$0xff]   ;;  %v1708_v29 = vld [vmem:[%s2239_s1 + $0xc0] sm:$0xff]   ;;  %v1716_v39 = vld [vmem:[%s2239_s1 + $0x138] sm:$0xff]   ;;  %v1841_v9 = vmov 0  }
  0x15   : > { %v1705_v26 = vld [vmem:[%s2239_s1 + $0x8] sm:$0xff]   ;;  %v1709_v30 = vld [vmem:[%s2239_s1] sm:$0xff]   ;;  %v1717_v40 = vld [vmem:[%s2239_s1 + $0x170] sm:$0xff]  }
  0x16   : > { %1586 = vmatpush3.bf16.msra.mxu0 %v1689_v10  ;;  %v1706_v27 = vld [vmem:[%s2239_s1 + $0x88] sm:$0xff]   ;;  %v1710_v31 = vld [vmem:[%s2239_s1 + $0x80] sm:$0xff]   ;;  %v1718_v41 = vld [vmem:[%s2239_s1 + $0x130] sm:$0xff]  }
  0x17   : > { %1608 = vmatpush3.bf16.msra.mxu1 %v1690_v11  ;;  %1587 = vmatprep.subr.bf16.mxu0 %v1691_v12  ;;  %v224_v32 = vld [vmem:[%s1980_s12] sm:$0xff]  ;;  %v225_v33 = vld [vmem:[%s1980_s12 + $0x8] sm:$0xff]  ;;  %v1723_v46 = vld [vmem:[%s2239_s1 + $0x158] sm:$0xff]  }
  0x18   : > { %1609 = vmatprep.subr.bf16.mxu1 %v1692_v13  ;;  %v1461_v34 = vcombine.low %v224_v32, %v224_v32  ;;  %v1462_v35 = vcombine.high %v224_v32, %v224_v32  ;;  %v1463_v36 = vcombine.low %v225_v33, %v225_v33  ;;  %v1464_v37 = vcombine.high %v225_v33, %v225_v33  ;;  %v1719_v42 = vld [vmem:[%s2239_s1 + $0x168] sm:$0xff]   ;;  %v1721_v44 = vld [vmem:[%s2239_s1 + $0x160] sm:$0xff]   ;;  %v1724_v47 = vld [vmem:[%s2239_s1 + $0x118] sm:$0xff]  }
  0x19   : > { %v1720_v43 = vld [vmem:[%s2239_s1 + $0x128] sm:$0xff]   ;;  %v1722_v45 = vld [vmem:[%s2239_s1 + $0x120] sm:$0xff]   ;;  %v226_v48 = vld [vmem:[%s1980_s12 + $0x10] sm:$0xff] }
  0x1a   : > { %1588 = vmatpush3.bf16.msra.mxu0 %v1693_v14  ;;  %664 = vmatprep.mubr.bf16.mxu0 %v1462_v35  ;;  %v1725_v49 = vld [vmem:[%s2239_s1 + $0x150] sm:$0xff]   ;;  %v1466_v50 = vcombine.high %v226_v48, %v226_v48  ;;  %v1727_v52 = vld [vmem:[%s2239_s1 + $0x148] sm:$0xff]   ;;  %v1729_v54 = vld [vmem:[%s2239_s1 + $0x140] sm:$0xff]   ;;  %v1465_v56 = vcombine.low %v226_v48, %v226_v48 }
  0x1b   : > { %1610 = vmatpush3.bf16.msra.mxu1 %v1694_v15  ;;  %1589 = vmatprep.subr.bf16.mxu0 %v1695_v16  ;;  %v1726_v51 = vld [vmem:[%s2239_s1 + $0x110] sm:$0xff]   ;;  %v1728_v53 = vld [vmem:[%s2239_s1 + $0x108] sm:$0xff]   ;;  %v1730_v55 = vld [vmem:[%s2239_s1 + $0x100] sm:$0xff]  }
  0x1c   : > { %1611 = vmatprep.subr.bf16.mxu1 %v1696_v17  ;;  %704 = vmatprep.mubr.bf16.mxu1 %v1464_v37  ;;  %v1733_v57 = vld [vmem:[%s2240_s2 + $0x70] ss:$8 sps:$4 sm:$0xff]   ;;  %v1735_v58 = vld [vmem:[%s2240_s2 + $0x74] ss:$8 sps:$4 sm:$0xff]   ;;  %v1738_v59 = vld [vmem:[%s2240_s2 + $0x64] ss:$8 sps:$4 sm:$0xff]  }
  0x1d   : > { %v1736_v60 = vld [vmem:[%s2240_s2 + $0x60] ss:$8 sps:$4 sm:$0xff]   ;;  %v1741_v61 = vld [vmem:[%s2240_s2 + $0x54] ss:$8 sps:$4 sm:$0xff]   ;;  %v1739_v62 = vld [vmem:[%s2240_s2 + $0x50] ss:$8 sps:$4 sm:$0xff]  }
  0x1e   : > { %1590 = vmatpush3.bf16.msra.mxu0 %v1697_v18  ;;  %v1744_v63 = vld [vmem:[%s2240_s2 + $0x44] ss:$8 sps:$4 sm:$0xff]   ;;  %v1742_v0 = vld [vmem:[%s2240_s2 + $0x40] ss:$8 sps:$4 sm:$0xff]   ;;  %v1747_v1 = vld [vmem:[%s2240_s2 + $0x34] ss:$8 sps:$4 sm:$0xff]  }
  0x1f   : > { %1612 = vmatpush3.bf16.msra.mxu1 %v1698_v19  ;;  %1591 = vmatprep.subr.bf16.mxu0 %v1699_v20  ;;  %v1745_v2 = vld [vmem:[%s2240_s2 + $0x30] ss:$8 sps:$4 sm:$0xff]   ;;  %v1750_v3 = vld [vmem:[%s2240_s2 + $0x24] ss:$8 sps:$4 sm:$0xff]   ;;  %v1748_v4 = vld [vmem:[%s2240_s2 + $0x20] ss:$8 sps:$4 sm:$0xff]  }
  0x20   : > { %1613 = vmatprep.subr.bf16.mxu1 %v1700_v21  ;;  %v1753_v5 = vld [vmem:[%s2240_s2 + $0x14] ss:$8 sps:$4 sm:$0xff]   ;;  %v1751_v6 = vld [vmem:[%s2240_s2 + $0x10] ss:$8 sps:$4 sm:$0xff]   ;;  %v1756_v7 = vld [vmem:[%s2240_s2 + $0x4] ss:$8 sps:$4 sm:$0xff]  }
  0x21   : > { %v1754_v8 = vld [vmem:[%s2240_s2] ss:$8 sps:$4 sm:$0xff]   ;;  %v1757_v10 = vld [vmem:[%s2241_s3 + $0x70] ss:$8 sps:$4 sm:$0xff]   ;;  %v1759_v11 = vld [vmem:[%s2241_s3 + $0x74] ss:$8 sps:$4 sm:$0xff]  }
  0x22   : > { %1592 = vmatpush3.bf16.msra.mxu0 %v1701_v22  ;;  %v1762_v12 = vld [vmem:[%s2241_s3 + $0x64] ss:$8 sps:$4 sm:$0xff]   ;;  %v1760_v13 = vld [vmem:[%s2241_s3 + $0x60] ss:$8 sps:$4 sm:$0xff]   ;;  %v1765_v32 = vld [vmem:[%s2241_s3 + $0x54] ss:$8 sps:$4 sm:$0xff]  }
  0x23   : > { %1614 = vmatpush3.bf16.msra.mxu1 %v1702_v23  ;;  %1593 = vmatprep.subr.bf16.mxu0 %v1703_v24  ;;  %v1763_v33 = vld [vmem:[%s2241_s3 + $0x50] ss:$8 sps:$4 sm:$0xff]   ;;  %v1766_v35 = vld [vmem:[%s2241_s3 + $0x40] ss:$8 sps:$4 sm:$0xff]   ;;  %v1789_v48 = vld [vmem:[%s2241_s3 + $0xd4] ss:$8 sps:$4 sm:$0xff]  }
  0x24   : > { %1615 = vmatprep.subr.bf16.mxu1 %v1704_v25  ;;  %v1769_v37 = vld [vmem:[%s2241_s3 + $0x30] ss:$8 sps:$4 sm:$0xff]  }
  0x26   : > { %1594 = vmatpush3.bf16.msra.mxu0 %v1705_v26 }
  0x27   : > { %1616 = vmatpush3.bf16.msra.mxu1 %v1706_v27  ;;  %1595 = vmatprep.subr.bf16.mxu0 %v1707_v28 }
  0x28   : > { %1617 = vmatprep.subr.bf16.mxu1 %v1708_v29 }
  0x2a   : > { %1596 = vmatpush3.bf16.msra.mxu0 %v1709_v30 }
  0x2b   : > { %1618 = vmatpush3.bf16.msra.mxu1 %v1710_v31  ;;  %1625 = vmatprep.subr.bf16.mxu0 %v1715_v38  ;;  %v1774_v38 = vld [vmem:[%s2241_s3 + $0x24] ss:$8 sps:$4 sm:$0xff]  }
  0x2c   : > { %849 = vmatprep.subr.bf16.mxu1 %v1735_v58  ;;  %v1804_v58 = vld [vmem:[%s2241_s3 + $0x84] ss:$8 sps:$4 sm:$0xff]  }
  0x2d   : > { %665 = vmatmul.mubr.bf16.vlgmr.msra.gmra.mxu0 %v1461_v34  ;;  %v1768_v34 = vld [vmem:[%s2241_s3 + $0x44] ss:$8 sps:$4 sm:$0xff]  }
  0x2e   : > { %705 = vmatmul.mubr.bf16.vlgmr.msra.gmra.mxu1 %v1463_v36  ;;  %1626 = vmatpush3.bf16.msra.mxu0 %v1716_v39  ;;  %v1771_v36 = vld [vmem:[%s2241_s3 + $0x34] ss:$8 sps:$4 sm:$0xff]   ;;  %v1772_v39 = vld [vmem:[%s2241_s3 + $0x20] ss:$8 sps:$4 sm:$0xff]  }
  0x2f   : > { %1627 = vmatprep.subr.bf16.mxu0 %v1717_v40  ;;  %744 = vmatprep.mubr.bf16.mxu0 %v1466_v50  ;;  %v1777_v40 = vld [vmem:[%s2241_s3 + $0x14] ss:$8 sps:$4 sm:$0xff]   ;;  %v1792_v50 = vld [vmem:[%s2241_s3 + $0xc4] ss:$8 sps:$4 sm:$0xff]  }
  0x30   : > { %850 = vmatpush1.bf16.msra.mxu1 %v1733_v57  ;;  %881 = vmatprep.mubr.bf16.mxu1 %v1841_v9  ;;  %v1799_v57 = vld [vmem:[%s2241_s3 + $0x90] ss:$8 sps:$4 sm:$0xff]  }
  0x31   : > { %851 = vmatprep.subr.bf16.mxu1 %v1738_v59  ;;  %v1802_v59 = vld [vmem:[%s2241_s3 + $0x80] ss:$8 sps:$4 sm:$0xff]  }
  0x32   : > { %1628 = vmatpush3.bf16.msra.mxu0 %v1718_v41  ;;  %v1775_v41 = vld [vmem:[%s2241_s3 + $0x10] ss:$8 sps:$4 sm:$0xff]  }
  0x33   : > { %1629 = vmatprep.subr.bf16.mxu0 %v1719_v42  ;;  %v1780_v42 = vld [vmem:[%s2241_s3 + $0x4] ss:$8 sps:$4 sm:$0xff]  }
  0x34   : > { %852 = vmatpush1.bf16.msra.mxu1 %v1736_v60 }
  0x35   : > { %853 = vmatprep.subr.bf16.mxu1 %v1741_v61 }
  0x36   : > { %1630 = vmatpush3.bf16.msra.mxu0 %v1720_v43  ;;  %v1778_v43 = vld [vmem:[%s2241_s3] ss:$8 sps:$4 sm:$0xff]  }
  0x37   : > { %1631 = vmatprep.subr.bf16.mxu0 %v1721_v44  ;;  %v1783_v44 = vld [vmem:[%s2241_s3 + $0xf4] ss:$8 sps:$4 sm:$0xff]  }
  0x38   : > { %854 = vmatpush1.bf16.msra.mxu1 %v1739_v62 }
  0x39   : > { %855 = vmatprep.subr.bf16.mxu1 %v1744_v63 }
  0x3a   : > { %1632 = vmatpush3.bf16.msra.mxu0 %v1722_v45  ;;  %v1781_v45 = vld [vmem:[%s2241_s3 + $0xf0] ss:$8 sps:$4 sm:$0xff]  }
  0x3b   : > { %1633 = vmatprep.subr.bf16.mxu0 %v1723_v46  ;;  %v1786_v46 = vld [vmem:[%s2241_s3 + $0xe4] ss:$8 sps:$4 sm:$0xff]  }
  0x3c   : > { %856 = vmatpush1.bf16.msra.mxu1 %v1742_v0 }
  0x3d   : > { %857 = vmatprep.subr.bf16.mxu1 %v1747_v1 }
  0x3e   : > { %1634 = vmatpush3.bf16.msra.mxu0 %v1724_v47  ;;  %v1784_v47 = vld [vmem:[%s2241_s3 + $0xe0] ss:$8 sps:$4 sm:$0xff]  }
  0x3f   : > { %1635 = vmatprep.subr.bf16.mxu0 %v1725_v49  ;;  %v1787_v49 = vld [vmem:[%s2241_s3 + $0xd0] ss:$8 sps:$4 sm:$0xff]  }
  0x40   : > { %858 = vmatpush1.bf16.msra.mxu1 %v1745_v2 }
  0x41   : > { %859 = vmatprep.subr.bf16.mxu1 %v1750_v3 }
  0x42   : > { %1636 = vmatpush3.bf16.msra.mxu0 %v1726_v51  ;;  %v1790_v51 = vld [vmem:[%s2241_s3 + $0xc0] ss:$8 sps:$4 sm:$0xff]  }
  0x43   : > { %1637 = vmatprep.subr.bf16.mxu0 %v1727_v52  ;;  %v1795_v52 = vld [vmem:[%s2241_s3 + $0xb4] ss:$8 sps:$4 sm:$0xff]  }
  0x44   : > { %860 = vmatpush1.bf16.msra.mxu1 %v1748_v4 }
  0x45   : > { %861 = vmatprep.subr.bf16.mxu1 %v1753_v5 }
  0x46   : > { %1638 = vmatpush3.bf16.msra.mxu0 %v1728_v53  ;;  %v1793_v53 = vld [vmem:[%s2241_s3 + $0xb0] ss:$8 sps:$4 sm:$0xff]  }
  0x47   : > { %1639 = vmatprep.subr.bf16.mxu0 %v1729_v54  ;;  %v1798_v54 = vld [vmem:[%s2241_s3 + $0xa4] ss:$8 sps:$4 sm:$0xff]  }
  0x48   : > { %862 = vmatpush1.bf16.msra.mxu1 %v1751_v6 }
  0x49   : > { %863 = vmatprep.subr.bf16.mxu1 %v1756_v7 }
  0x4a   : > { %1640 = vmatpush3.bf16.msra.mxu0 %v1730_v55  ;;  %v1796_v55 = vld [vmem:[%s2241_s3 + $0xa0] ss:$8 sps:$4 sm:$0xff]  }
  0x4b   : > { %1124 = vmatprep.subr.bf16.mxu0 %v1759_v11 }
  0x4c   : > { %864 = vmatpush1.bf16.msra.mxu1 %v1754_v8 }
  0x4d   : > { %745 = vmatmul.mubr.bf16.vlgmr.msra.gmra.mxu0 %v1465_v56  ;;  %v1801_v56 = vld [vmem:[%s2241_s3 + $0x94] ss:$8 sps:$4 sm:$0xff]  }
  0x4e   : > { %1125 = vmatpush1.bf16.msra.mxu0 %v1757_v10 }
  0x4f   : > { %1126 = vmatprep.subr.bf16.mxu0 %v1762_v12 }
  0x52   : > { %1127 = vmatpush1.bf16.msra.mxu0 %v1760_v13 }
  0x53   : > { %1128 = vmatprep.subr.bf16.mxu0 %v1765_v32 }
  0x56   : > { %1129 = vmatpush1.bf16.msra.mxu0 %v1763_v33 }
  0x57   : > { %1130 = vmatprep.subr.bf16.mxu0 %v1768_v34 }
  0x5a   : > { %1131 = vmatpush1.bf16.msra.mxu0 %v1766_v35 }
  0x5b   : > { %1132 = vmatprep.subr.bf16.mxu0 %v1771_v36 }
  0x5e   : > { %1133 = vmatpush1.bf16.msra.mxu0 %v1769_v37 }
  0x5f   : > { %1134 = vmatprep.subr.bf16.mxu0 %v1774_v38 }
  0x62   : > { %1135 = vmatpush1.bf16.msra.mxu0 %v1772_v39 }
  0x63   : > { %1136 = vmatprep.subr.bf16.mxu0 %v1777_v40 }
  0x66   : > { %1137 = vmatpush1.bf16.msra.mxu0 %v1775_v41 }
  0x67   : > { %1138 = vmatprep.subr.bf16.mxu0 %v1780_v42  ;;  %v1805_v42 = vld [vmem:[%s2242_s4 + $0x78] sm:$0xff]  }
  0x68   : > { %1647 = vmatprep.subr.bf16.mxu1 %v1805_v42 }
  0x6a   : > { %1139 = vmatpush1.bf16.msra.mxu0 %v1778_v43  ;;  %v1806_v43 = vld [vmem:[%s2242_s4 + $0x38] sm:$0xff]  }
  0x6b   : > { %1140 = vmatprep.subr.bf16.mxu0 %v1783_v44  ;;  %v1807_v44 = vld [vmem:[%s2242_s4 + $0x70] sm:$0xff]  }
  0x6e   : > { %1141 = vmatpush2.bf16.msra.mxu0 %v1781_v45  ;;  %v1808_v45 = vld [vmem:[%s2242_s4 + $0x30] sm:$0xff]  }
  0x6f   : > { %1142 = vmatprep.subr.bf16.mxu0 %v1786_v46  ;;  %v1809_v46 = vld [vmem:[%s2242_s4 + $0x68] sm:$0xff]  }
  0x72   : > { %1143 = vmatpush2.bf16.msra.mxu0 %v1784_v47  ;;  %v1810_v47 = vld [vmem:[%s2242_s4 + $0x28] sm:$0xff]  }
  0x73   : > { %1144 = vmatprep.subr.bf16.mxu0 %v1789_v48  ;;  %v1811_v48 = vld [vmem:[%s2242_s4 + $0x60] sm:$0xff]  }
  0x76   : > { %1145 = vmatpush2.bf16.msra.mxu0 %v1787_v49  ;;  %v1812_v49 = vld [vmem:[%s2242_s4 + $0x20] sm:$0xff]  }
  0x77   : > { %1146 = vmatprep.subr.bf16.mxu0 %v1792_v50  ;;  %v1813_v50 = vld [vmem:[%s2242_s4 + $0x58] sm:$0xff]  }
  0x7a   : > { %1147 = vmatpush2.bf16.msra.mxu0 %v1790_v51  ;;  %v1814_v51 = vld [vmem:[%s2242_s4 + $0x18] sm:$0xff]  }
  0x7b   : > { %1148 = vmatprep.subr.bf16.mxu0 %v1795_v52  ;;  %v1815_v52 = vld [vmem:[%s2242_s4 + $0x50] sm:$0xff]  }
  0x7e   : > { %1149 = vmatpush2.bf16.msra.mxu0 %v1793_v53  ;;  %v1816_v53 = vld [vmem:[%s2242_s4 + $0x10] sm:$0xff]  }
  0x7f   : > { %1150 = vmatprep.subr.bf16.mxu0 %v1798_v54  ;;  %v1817_v54 = vld [vmem:[%s2242_s4 + $0x48] sm:$0xff]  }
  0x82   : > { %1151 = vmatpush2.bf16.msra.mxu0 %v1796_v55  ;;  %v1818_v55 = vld [vmem:[%s2242_s4 + $0x8] sm:$0xff]  }
  0x83   : > { %1152 = vmatprep.subr.bf16.mxu0 %v1801_v56  ;;  %v1819_v56 = vld [vmem:[%s2242_s4 + $0x40] sm:$0xff]  }
  0x86   : > { %1153 = vmatpush2.bf16.msra.mxu0 %v1799_v57  ;;  %v1820_v57 = vld [vmem:[%s2242_s4] sm:$0xff]  }
  0x87   : > { %1154 = vmatprep.subr.bf16.mxu0 %v1804_v58 }
  0x8a   : > { %1155 = vmatpush2.bf16.msra.mxu0 %v1802_v59 }
  0xed   : > { %v1597_v14 = vpop.f32.mrf.mxu0 }
  0xee   : > { %v1619_v15 = vpop.f32.mrf.mxu1 }
  0xef   : > { %v1598_v16 = vpop.f32.mrf.mxu0 }
  0xf0   : > { %v1620_v17 = vpop.f32.mrf.mxu1  ;;  %v1599_v22 = vadd.f32 %v1598_v16, %v1597_v14 }
  0xf1   : > { %v1600_v18 = vpop.f32.mrf.mxu0  ;;  %v1621_v23 = vadd.f32 %v1620_v17, %v1619_v15 }
  0xf2   : > { %v1622_v19 = vpop.f32.mrf.mxu1 }
  0xf3   : > { %v1601_v20 = vpop.f32.mrf.mxu0  ;;  %v707_v26 = vadd.f32 %v1621_v23, %v1599_v22 }
  0xf4   : > { %v1623_v21 = vpop.f32.mrf.mxu1 }
 0x10d   : > { %v1641_v24 = vpop.f32.mrf.mxu0 }
 0x10f   : > { %v1642_v25 = vpop.f32.mrf.mxu0 }
 0x110   : > { %v1643_v27 = vadd.f32 %v1642_v25, %v1641_v24 }
 0x111   : > { %v1644_v28 = vpop.f32.mrf.mxu0 }
 0x112   : > { %v747_v29 = vadd.f32 %v1643_v27, %v707_v26 }
 0x113   : > { %v1645_v30 = vpop.f32.mrf.mxu0 }
 0x114   : > { %v752_v31 = vpack.c.bf16 %v747_v29, %v747_v29 }
 0x116   : > { %882 = vmatmul.mubr.bf16.vlgmr.msra.gmra.mxu1 %v752_v31 }
 0x117   : > { %1648 = vmatpush3.bf16.msra.mxu1 %v1806_v43 }
 0x118   : > { %1649 = vmatprep.subr.bf16.mxu1 %v1807_v44 }
 0x11b   : > { %1650 = vmatpush3.bf16.msra.mxu1 %v1808_v45 }
 0x11c   : > { %1651 = vmatprep.subr.bf16.mxu1 %v1809_v46 }
 0x11f   : > { %1652 = vmatpush3.bf16.msra.mxu1 %v1810_v47 }
 0x120   : > { %1653 = vmatprep.subr.bf16.mxu1 %v1811_v48 }
 0x123   : > { %1654 = vmatpush3.bf16.msra.mxu1 %v1812_v49 }
 0x124   : > { %1655 = vmatprep.subr.bf16.mxu1 %v1813_v50 }
 0x127   : > { %1656 = vmatpush3.bf16.msra.mxu1 %v1814_v51 }
 0x128   : > { %1657 = vmatprep.subr.bf16.mxu1 %v1815_v52 }
 0x12b   : > { %1658 = vmatpush3.bf16.msra.mxu1 %v1816_v53 }
 0x12c   : > { %1659 = vmatprep.subr.bf16.mxu1 %v1817_v54 }
 0x12f   : > { %1660 = vmatpush3.bf16.msra.mxu1 %v1818_v55 }
 0x130   : > { %1661 = vmatprep.subr.bf16.mxu1 %v1819_v56 }
 0x133   : > { %1662 = vmatpush3.bf16.msra.mxu1 %v1820_v57 }
 0x1d6   : > { %v883_v60 = vpop.f32.mrf.mxu1 }
 0x1d7   : > { %v890_v61 = vrot.slane %v883_v60, 4 }
 0x1d8   : > { %v885_v62 = vpop.f32.mrf.mxu1 }
 0x1d9   : > { %v891_v63 = vadd.f32 %v890_v61, %v883_v60  ;;  %v896_v0 = vrot.slane %v885_v62, 4 }
 0x1da   : > { %v887_v1 = vpop.f32.mrf.mxu1 }
 0x1db   : > { %v892_v2 = vrot.slane %v891_v63, 2  ;;  %v897_v3 = vadd.f32 %v896_v0, %v885_v62 }
 0x1dc   : > { %v888_v4 = vpop.f32.mrf.mxu1 }
 0x1dd   : > { %v893_v5 = vadd.f32 %v892_v2, %v891_v63  ;;  %v898_v6 = vrot.slane %v897_v3, 2 }
 0x1df   : > { %v894_v7 = vrot.slane %v893_v5, 1  ;;  %v899_v8 = vadd.f32 %v898_v6, %v897_v3 }
 0x1e1   : > { %v895_v9 = vadd.f32 %v894_v7, %v893_v5  ;;  %v900_v10 = vrot.slane %v899_v8, 1 }
 0x1e3   : > { %v902_v11 = vmul.f32 0.125, %v895_v9  ;;  %v901_v12 = vadd.f32 %v900_v10, %v899_v8 }
 0x1e5   : > { %v904_v13 = vsub.f32 %v883_v60, %v902_v11  ;;  %v903_v14 = vmul.f32 0.125, %v901_v12 }
 0x1e7   : > { %v906_v15 = vmul.f32 %v904_v13, %v904_v13  ;;  %v905_v16 = vsub.f32 %v885_v62, %v903_v14 }
 0x1e9   : > { %v908_v17 = vrot.slane %v906_v15, 4  ;;  %v907_v18 = vmul.f32 %v905_v16, %v905_v16 }
 0x1eb   : > { %v909_v19 = vadd.f32 %v908_v17, %v906_v15  ;;  %v914_v20 = vrot.slane %v907_v18, 4 }
 0x1ed   : > { %v910_v21 = vrot.slane %v909_v19, 2  ;;  %v915_v22 = vadd.f32 %v914_v20, %v907_v18 }
 0x1ef   : > { %v911_v23 = vadd.f32 %v910_v21, %v909_v19  ;;  %v916_v24 = vrot.slane %v915_v22, 2 }
 0x1f1   : > { %v912_v25 = vrot.slane %v911_v23, 1  ;;  %v917_v26 = vadd.f32 %v916_v24, %v915_v22 }
 0x1f3   : > { %v913_v27 = vadd.f32 %v912_v25, %v911_v23  ;;  %v918_v28 = vrot.slane %v917_v26, 1 }
 0x1f5   : > { %v920_v29 = vmul.f32 0.125, %v913_v27  ;;  %v919_v30 = vadd.f32 %v918_v28, %v917_v26 }
 0x1f7   : > { %v922_v31 = vadd.f32 1e-05, %v920_v29  ;;  %v921_v32 = vmul.f32 0.125, %v919_v30 }
 0x1f9   : > { %1821 = vrsqrt.f32 %v922_v31  ;;  %v923_v33 = vadd.f32 1e-05, %v921_v32 }
 0x1fb   : > { %1823 = vrsqrt.f32 %v923_v33 }
 0x206   : > { %v1822_v34 = vpop.eup %1821 }
 0x207   : > { %v926_v35 = vmul.f32 %v1822_v34, %v904_v13 }
 0x208   : > { %v1824_v36 = vpop.eup %1823 }
 0x209   : > { %v927_v37 = vmul.f32 %v1824_v36, %v905_v16  ;;  %v928_v38 = vmax.f32 %v926_v35, 0.0 }
 0x20b   : > { %v929_v39 = vmax.f32 %v927_v37, 0.0  ;;  %v930_v41 = vpack.c.bf16 %v928_v38, %v928_v38 }
 0x20d   : > { %v931_v40 = vpack.c.bf16 %v929_v39, %v929_v39 }
 0x20f   : > { %1156 = vmatprep.mubr.bf16.mxu0 %v931_v40 }
 0x210   : > { %1157 = vmatmul.mubr.bf16.vlgmr.msra.gmra.mxu0 %v930_v41 }
 0x2d0   : > { %v1158_v58 = vpop.f32.mrf.mxu0 }
 0x2d1   : > { %v1165_v59 = vrot.slane %v1158_v58, 4 }
 0x2d2   : > { %v1160_v60 = vpop.f32.mrf.mxu0 }
 0x2d3   : > { %v1166_v61 = vadd.f32 %v1165_v59, %v1158_v58  ;;  %v1171_v62 = vrot.slane %v1160_v60, 4 }
 0x2d4   : > { %v1162_v63 = vpop.f32.mrf.mxu0 }
 0x2d5   : > { %v1167_v0 = vrot.slane %v1166_v61, 2  ;;  %v1172_v1 = vadd.f32 %v1171_v62, %v1160_v60 }
 0x2d6   : > { %v1163_v2 = vpop.f32.mrf.mxu0 }
 0x2d7   : > { %v1168_v3 = vadd.f32 %v1167_v0, %v1166_v61  ;;  %v1173_v4 = vrot.slane %v1172_v1, 2 }
 0x2d9   : > { %v1169_v5 = vrot.slane %v1168_v3, 1  ;;  %v1174_v6 = vadd.f32 %v1173_v4, %v1172_v1 }
 0x2db   : > { %v1170_v7 = vadd.f32 %v1169_v5, %v1168_v3  ;;  %v1175_v8 = vrot.slane %v1174_v6, 1 }
 0x2dd   : > { %v1177_v9 = vmul.f32 0.125, %v1170_v7  ;;  %v1176_v10 = vadd.f32 %v1175_v8, %v1174_v6 }
 0x2df   : > { %v1179_v11 = vsub.f32 %v1158_v58, %v1177_v9  ;;  %v1178_v12 = vmul.f32 0.125, %v1176_v10 }
 0x2e1   : > { %v1181_v13 = vmul.f32 %v1179_v11, %v1179_v11  ;;  %v1180_v14 = vsub.f32 %v1160_v60, %v1178_v12 }
 0x2e3   : > { %v1183_v15 = vrot.slane %v1181_v13, 4  ;;  %v1182_v16 = vmul.f32 %v1180_v14, %v1180_v14 }
 0x2e5   : > { %v1184_v17 = vadd.f32 %v1183_v15, %v1181_v13  ;;  %v1189_v18 = vrot.slane %v1182_v16, 4 }
 0x2e7   : > { %v1185_v19 = vrot.slane %v1184_v17, 2  ;;  %v1190_v20 = vadd.f32 %v1189_v18, %v1182_v16 }
 0x2e9   : > { %v1186_v21 = vadd.f32 %v1185_v19, %v1184_v17  ;;  %v1191_v22 = vrot.slane %v1190_v20, 2 }
 0x2eb   : > { %v1187_v23 = vrot.slane %v1186_v21, 1  ;;  %v1192_v24 = vadd.f32 %v1191_v22, %v1190_v20 }
 0x2ed   : > { %v1188_v25 = vadd.f32 %v1187_v23, %v1186_v21  ;;  %v1193_v26 = vrot.slane %v1192_v24, 1 }
 0x2ef   : > { %v1195_v27 = vmul.f32 0.125, %v1188_v25  ;;  %v1194_v28 = vadd.f32 %v1193_v26, %v1192_v24 }
 0x2f1   : > { %v1197_v29 = vadd.f32 1e-05, %v1195_v27  ;;  %v1196_v30 = vmul.f32 0.125, %v1194_v28 }
 0x2f3   : > { %1825 = vrsqrt.f32 %v1197_v29  ;;  %v1198_v31 = vadd.f32 1e-05, %v1196_v30 }
 0x2f5   : > { %1827 = vrsqrt.f32 %v1198_v31 }
 0x300   : > { %v1826_v32 = vpop.eup %1825 }
 0x301   : > { %v1201_v33 = vmul.f32 %v1826_v32, %v1179_v11 }
 0x302   : > { %v1828_v34 = vpop.eup %1827 }
 0x303   : > { %v1202_v35 = vmul.f32 %v1828_v34, %v1180_v14  ;;  %v1203_v36 = vmax.f32 %v1201_v33, 0.0 }
 0x305   : > { %v1204_v37 = vmax.f32 %v1202_v35, 0.0  ;;  %v1205_v39 = vpack.c.bf16 %v1203_v36, %v1203_v36 }
 0x307   : > { %v1206_v38 = vpack.c.bf16 %v1204_v37, %v1204_v37 }
 0x309   : > { %1367 = vmatprep.mubr.bf16.mxu1 %v1206_v38 }
 0x30a   : > { %1368 = vmatmul.mubr.bf16.vlgmr.msra.gmra.mxu1 %v1205_v39 }
 0x3ca   : > { %v1663_v40 = vpop.f32.mrf.mxu1 }
 0x3cc   : > { %v1664_v41 = vpop.f32.mrf.mxu1 }
 0x3cd   : > { %v1665_v42 = vadd.f32 %v1664_v41, %v1663_v40 }
 0x3ce   : > { %v1666_v43 = vpop.f32.mrf.mxu1 }
 0x3cf   : > { %v1375_v44 = vrot.slane %v1665_v42, 4 }
 0x3d0   : > { %v1667_v45 = vpop.f32.mrf.mxu1 }
 0x3d1   : > { %v1376_v46 = vadd.f32 %v1665_v42, %v1375_v44 }
 0x3d3   : > { %v1377_v47 = vrot.slane %v1376_v46, 2 }
 0x3d5   : > { %v1378_v48 = vadd.f32 %v1377_v47, %v1376_v46 }
 0x3d7   : > { %v1379_v49 = vrot.slane %v1378_v48, 1 }
 0x3d9   : > { %v1380_v50 = vadd.f32 %v1379_v49, %v1378_v48 }
 0x3db   : > { %v1381_v51 = vmul.f32 0.125, %v1380_v50 }
 0x3dd   : > { %v1382_v52 = vsub.f32 %v1665_v42, %v1381_v51 }
 0x3df   : > { %v1383_v53 = vmul.f32 %v1382_v52, %v1382_v52 }
 0x3e1   : > { %v1384_v54 = vrot.slane %v1383_v53, 4 }
 0x3e3   : > { %v1385_v55 = vadd.f32 %v1384_v54, %v1383_v53 }
 0x3e5   : > { %v1386_v56 = vrot.slane %v1385_v55, 2 }
 0x3e7   : > { %v1387_v57 = vadd.f32 %v1386_v56, %v1385_v55 }
 0x3e9   : > { %v1388_v58 = vrot.slane %v1387_v57, 1 }
 0x3eb   : > { %v1389_v59 = vadd.f32 %v1388_v58, %v1387_v57 }
 0x3ed   : > { %v1390_v60 = vmul.f32 0.125, %v1389_v59 }
 0x3ef   : > { %v1391_v61 = vadd.f32 1e-05, %v1390_v60 }
 0x3f1   : > { %1829 = vrsqrt.f32 %v1391_v61 }
 0x3fe   : > { %v1830_v62 = vpop.eup %1829 }
 0x3ff   : > { %v1393_v63 = vmul.f32 %v1830_v62, %v1382_v52 }
 0x401   : > { %v1394_v0 = vmul.f32 %v1393_v63, %v1393_v63 }
 0x403   : > { %1395 = vadd.xlane.f32.xlu0 %v1394_v0 }
 0x48c   : > { %v1396_v1 = vpop.xlane.xlu0 %1395 }
 0x48d   : > { %v1397_v2 = vmax.f32 %v1396_v1, 1e-24 }
 0x48f   : > { %1831 = vrsqrt.f32 %v1397_v2 }
 0x49c   : > { %v1832_v3 = vpop.eup %1831 }
 0x49d   : > { %v1399_v4 = vmul.f32 %v1832_v3, %v1393_v63 }
 0x49f   : > { %1400 = vst [vmem:[%s222_s22] sm:$0xff] %v1399_v4 }
 0x4a0 PF: > { %s15_s18 = sadd.s32 1, %s1839_s18  }
 0x4a1   : > { %p12_p4 = scmp.ge.s32.totalorder %s15_s18, 4  }
 0x4a3   :  { %14 = sbr.rel (!%p12_p4) target bundleno = 1 (0x1), region = 70 }

// kernel: moco_forward.3
= control target key start
LH: loop header
LB: loop body
LE: loop exit
PB: predicated region body
PF: predicated region fallthrough
CT: control target
= control target key end

     0   :  { %s2403_s24 = smov 0   ;;  %s2867_s0 = inlined_call_operand.vmem [shape: bf16[2,8,768], index: 0, kind: input, shape index: {}]   ;;  %s2868_s1 = inlined_call_operand.vmem [shape: bf16[768,128], index: 1, kind: input, shape index: {}]   ;;  %s2869_s2 = inlined_call_operand.vmem [shape: bf16[128,256], index: 2, kind: input, shape index: {}]   ;;  %s2870_s3 = inlined_call_operand.vmem [shape: bf16[256,256], index: 3, kind: input, shape index: {}]   ;;  %s2871_s4 = inlined_call_operand.vmem [shape: bf16[256,128], index: 4, kind: input, shape index: {}]   ;;  %s2872_s5 = inlined_call_operand.vmem [shape: bf16[128,256], index: 5, kind: input, shape index: {}]   ;;  %s2873_s6 = inlined_call_operand.vmem [shape: bf16[256,128], index: 6, kind: input, shape index: {}]   ;;  %s2874_s7 = inlined_call_operand.vmem [shape: f32[2,8,128], index: 7, kind: output, shape index: {}]  }
   0x1 LB: > { %s1875_s25 = sadd.s32 4294967295, %s2360_s24   ;;  %p1879_p0 = scmp.ge.s32.totalorder %s2360_s24, 1  ;;  %s2360_s24 = sphi %s2403_s24, %s17_s24  }
   0x2   : > { %p237_p1 = scmp.lt.s32.totalorder %s2360_s24, 3 }
   0x4   : > { %p238_p2 = pnand %p1879_p0, %p237_p1 }
   0x5   : > { %p268_p3 = scmp.lt.s32.totalorder (!%p238_p2), %s1875_s25, 1 }
   0x6   : > { %241 = sbr.rel (%p238_p2) target bundleno = 1683 (0x693), region = 48 }
   0xb   : > { %v2154_v0 = vld [vmem:[%s2868_s1 + $0x78] sm:$0xff]   ;;  %v2158_v4 = vld [vmem:[%s2868_s1 + $0x70] sm:$0xff]   ;;  %v2162_v8 = vld [vmem:[%s2868_s1 + $0x68] sm:$0xff]   ;;  %s2876_s25 = smov (!%p268_p3, %s1875_s25), 1 }
   0xc   : > { %v2155_v1 = vld [vmem:[%s2868_s1 + $0xf8] sm:$0xff]   ;;  %2034 = vmatprep.subr.bf16.mxu0 %v2154_v0  ;;  %v2159_v5 = vld [vmem:[%s2868_s1 + $0xf0] sm:$0xff]   ;;  %v2163_v9 = vld [vmem:[%s2868_s1 + $0xe8] sm:$0xff]   ;;  %s2144_s13 = smul.u32 24, %s2876_s25  ;;  %s1881_s22 = sshll.u32 %s2876_s25, 3 }
   0xd   : > { %v2156_v2 = vld [vmem:[%s2868_s1 + $0x38] sm:$0xff]   ;;  %2056 = vmatprep.subr.bf16.mxu1 %v2155_v1  ;;  %v2160_v6 = vld [vmem:[%s2868_s1 + $0x30] sm:$0xff]   ;;  %v2164_v10 = vld [vmem:[%s2868_s1 + $0x28] sm:$0xff]   ;;  %s276_s28 = scalar_lea.vmem %s2874_s7, %s1881_s22 }
   0xe   : > { %v2157_v3 = vld [vmem:[%s2868_s1 + $0xb8] sm:$0xff]   ;;  %2035 = vmatpush3.bf16.msra.mxu0 %v2156_v2  ;;  %v2161_v7 = vld [vmem:[%s2868_s1 + $0xb0] sm:$0xff]   ;;  %v2165_v11 = vld [vmem:[%s2868_s1 + $0xa8] sm:$0xff]   ;;  %s2511_s26 = scalar_lea.vmem %s2867_s0, %s2144_s13 }
   0xf   : > { %2057 = vmatpush3.bf16.msra.mxu1 %v2157_v3  ;;  %2036 = vmatprep.subr.bf16.mxu0 %v2158_v4  ;;  %v2166_v12 = vld [vmem:[%s2868_s1 + $0x60] sm:$0xff]   ;;  %v2170_v16 = vld [vmem:[%s2868_s1 + $0x58] sm:$0xff]   ;;  %v2174_v20 = vld [vmem:[%s2868_s1 + $0x50] sm:$0xff]  }
  0x10   : > { %2058 = vmatprep.subr.bf16.mxu1 %v2159_v5  ;;  %v2167_v13 = vld [vmem:[%s2868_s1 + $0xe0] sm:$0xff]   ;;  %v2171_v17 = vld [vmem:[%s2868_s1 + $0xd8] sm:$0xff]   ;;  %v2175_v21 = vld [vmem:[%s2868_s1 + $0xd0] sm:$0xff]  }
  0x11   : > { %v2168_v14 = vld [vmem:[%s2868_s1 + $0x20] sm:$0xff]   ;;  %v2172_v18 = vld [vmem:[%s2868_s1 + $0x18] sm:$0xff]   ;;  %v2176_v22 = vld [vmem:[%s2868_s1 + $0x10] sm:$0xff]  }
  0x12   : > { %2037 = vmatpush3.bf16.msra.mxu0 %v2160_v6  ;;  %v2169_v15 = vld [vmem:[%s2868_s1 + $0xa0] sm:$0xff]   ;;  %v2173_v19 = vld [vmem:[%s2868_s1 + $0x98] sm:$0xff]   ;;  %v2177_v23 = vld [vmem:[%s2868_s1 + $0x90] sm:$0xff]  }
  0x13   : > { %2059 = vmatpush3.bf16.msra.mxu1 %v2161_v7  ;;  %2038 = vmatprep.subr.bf16.mxu0 %v2162_v8  ;;  %v2178_v24 = vld [vmem:[%s2868_s1 + $0x48] sm:$0xff]   ;;  %v2182_v28 = vld [vmem:[%s2868_s1 + $0x40] sm:$0xff]   ;;  %v2190_v38 = vld [vmem:[%s2868_s1 + $0x178] sm:$0xff]  }
  0x14   : > { %2060 = vmatprep.subr.bf16.mxu1 %v2163_v9  ;;  %v2179_v25 = vld [vmem:[%s2868_s1 + $0xc8] sm:$0xff]   ;;  %v2183_v29 = vld [vmem:[%s2868_s1 + $0xc0] sm:$0xff]   ;;  %v2191_v39 = vld [vmem:[%s2868_s1 + $0x138] sm:$0xff]   ;;  %v2362_v9 = vmov 0  }
  0x15   : > { %v2180_v26 = vld [vmem:[%s2868_s1 + $0x8] sm:$0xff]   ;;  %v2184_v30 = vld [vmem:[%s2868_s1] sm:$0xff]   ;;  %v2192_v40 = vld [vmem:[%s2868_s1 + $0x170] sm:$0xff]  }
  0x16   : > { %2039 = vmatpush3.bf16.msra.mxu0 %v2164_v10  ;;  %v2181_v27 = vld [vmem:[%s2868_s1 + $0x88] sm:$0xff]   ;;  %v2185_v31 = vld [vmem:[%s2868_s1 + $0x80] sm:$0xff]   ;;  %v2193_v41 = vld [vmem:[%s2868_s1 + $0x130] sm:$0xff]  }
  0x17   : > { %2061 = vmatpush3.bf16.msra.mxu1 %v2165_v11  ;;  %2040 = vmatprep.subr.bf16.mxu0 %v2166_v12  ;;  %v278_v32 = vld [vmem:[%s2511_s26] sm:$0xff]  ;;  %v279_v33 = vld [vmem:[%s2511_s26 + $0x8] sm:$0xff]  ;;  %v2198_v46 = vld [vmem:[%s2868_s1 + $0x158] sm:$0xff]  }
  0x18   : > { %2062 = vmatprep.subr.bf16.mxu1 %v2167_v13  ;;  %v1882_v34 = vcombine.low %v278_v32, %v278_v32  ;;  %v1883_v35 = vcombine.high %v278_v32, %v278_v32  ;;  %v1884_v36 = vcombine.low %v279_v33, %v279_v33  ;;  %v1885_v37 = vcombine.high %v279_v33, %v279_v33  ;;  %v2194_v42 = vld [vmem:[%s2868_s1 + $0x168] sm:$0xff]   ;;  %v2196_v44 = vld [vmem:[%s2868_s1 + $0x160] sm:$0xff]   ;;  %v2199_v47 = vld [vmem:[%s2868_s1 + $0x118] sm:$0xff]  }
  0x19   : > { %v2195_v43 = vld [vmem:[%s2868_s1 + $0x128] sm:$0xff]   ;;  %v2197_v45 = vld [vmem:[%s2868_s1 + $0x120] sm:$0xff]   ;;  %v280_v48 = vld [vmem:[%s2511_s26 + $0x10] sm:$0xff] }
  0x1a   : > { %2041 = vmatpush3.bf16.msra.mxu0 %v2168_v14  ;;  %718 = vmatprep.mubr.bf16.mxu0 %v1883_v35  ;;  %v2200_v49 = vld [vmem:[%s2868_s1 + $0x150] sm:$0xff]   ;;  %v1887_v50 = vcombine.high %v280_v48, %v280_v48  ;;  %v2202_v52 = vld [vmem:[%s2868_s1 + $0x148] sm:$0xff]   ;;  %v2204_v54 = vld [vmem:[%s2868_s1 + $0x140] sm:$0xff]   ;;  %v1886_v56 = vcombine.low %v280_v48, %v280_v48 }
  0x1b   : > { %2063 = vmatpush3.bf16.msra.mxu1 %v2169_v15  ;;  %2042 = vmatprep.subr.bf16.mxu0 %v2170_v16  ;;  %v2201_v51 = vld [vmem:[%s2868_s1 + $0x110] sm:$0xff]   ;;  %v2203_v53 = vld [vmem:[%s2868_s1 + $0x108] sm:$0xff]   ;;  %v2205_v55 = vld [vmem:[%s2868_s1 + $0x100] sm:$0xff]  }
  0x1c   : > { %2064 = vmatprep.subr.bf16.mxu1 %v2171_v17  ;;  %758 = vmatprep.mubr.bf16.mxu1 %v1885_v37  ;;  %v2208_v57 = vld [vmem:[%s2869_s2 + $0x70] ss:$8 sps:$4 sm:$0xff]   ;;  %v2210_v58 = vld [vmem:[%s2869_s2 + $0x74] ss:$8 sps:$4 sm:$0xff]   ;;  %v2213_v59 = vld [vmem:[%s2869_s2 + $0x64] ss:$8 sps:$4 sm:$0xff]  }
  0x1d   : > { %v2211_v60 = vld [vmem:[%s2869_s2 + $0x60] ss:$8 sps:$4 sm:$0xff]   ;;  %v2216_v61 = vld [vmem:[%s2869_s2 + $0x54] ss:$8 sps:$4 sm:$0xff]   ;;  %v2214_v62 = vld [vmem:[%s2869_s2 + $0x50] ss:$8 sps:$4 sm:$0xff]  }
  0x1e   : > { %2043 = vmatpush3.bf16.msra.mxu0 %v2172_v18  ;;  %v2219_v63 = vld [vmem:[%s2869_s2 + $0x44] ss:$8 sps:$4 sm:$0xff]   ;;  %v2217_v0 = vld [vmem:[%s2869_s2 + $0x40] ss:$8 sps:$4 sm:$0xff]   ;;  %v2222_v1 = vld [vmem:[%s2869_s2 + $0x34] ss:$8 sps:$4 sm:$0xff]  }
  0x1f   : > { %2065 = vmatpush3.bf16.msra.mxu1 %v2173_v19  ;;  %2044 = vmatprep.subr.bf16.mxu0 %v2174_v20  ;;  %v2220_v2 = vld [vmem:[%s2869_s2 + $0x30] ss:$8 sps:$4 sm:$0xff]   ;;  %v2225_v3 = vld [vmem:[%s2869_s2 + $0x24] ss:$8 sps:$4 sm:$0xff]   ;;  %v2223_v4 = vld [vmem:[%s2869_s2 + $0x20] ss:$8 sps:$4 sm:$0xff]  }
  0x20   : > { %2066 = vmatprep.subr.bf16.mxu1 %v2175_v21  ;;  %v2228_v5 = vld [vmem:[%s2869_s2 + $0x14] ss:$8 sps:$4 sm:$0xff]   ;;  %v2226_v6 = vld [vmem:[%s2869_s2 + $0x10] ss:$8 sps:$4 sm:$0xff]   ;;  %v2231_v7 = vld [vmem:[%s2869_s2 + $0x4] ss:$8 sps:$4 sm:$0xff]  }
  0x21   : > { %v2229_v8 = vld [vmem:[%s2869_s2] ss:$8 sps:$4 sm:$0xff]   ;;  %v2232_v10 = vld [vmem:[%s2870_s3 + $0x70] ss:$8 sps:$4 sm:$0xff]   ;;  %v2234_v11 = vld [vmem:[%s2870_s3 + $0x74] ss:$8 sps:$4 sm:$0xff]  }
  0x22   : > { %2045 = vmatpush3.bf16.msra.mxu0 %v2176_v22  ;;  %v2237_v12 = vld [vmem:[%s2870_s3 + $0x64] ss:$8 sps:$4 sm:$0xff]   ;;  %v2235_v13 = vld [vmem:[%s2870_s3 + $0x60] ss:$8 sps:$4 sm:$0xff]   ;;  %v2240_v32 = vld [vmem:[%s2870_s3 + $0x54] ss:$8 sps:$4 sm:$0xff]  }
  0x23   : > { %2067 = vmatpush3.bf16.msra.mxu1 %v2177_v23  ;;  %2046 = vmatprep.subr.bf16.mxu0 %v2178_v24  ;;  %v2238_v33 = vld [vmem:[%s2870_s3 + $0x50] ss:$8 sps:$4 sm:$0xff]   ;;  %v2241_v35 = vld [vmem:[%s2870_s3 + $0x40] ss:$8 sps:$4 sm:$0xff]   ;;  %v2264_v48 = vld [vmem:[%s2870_s3 + $0xd4] ss:$8 sps:$4 sm:$0xff]  }
  0x24   : > { %2068 = vmatprep.subr.bf16.mxu1 %v2179_v25  ;;  %v2244_v37 = vld [vmem:[%s2870_s3 + $0x30] ss:$8 sps:$4 sm:$0xff]  }
  0x26   : > { %2047 = vmatpush3.bf16.msra.mxu0 %v2180_v26 }
  0x27   : > { %2069 = vmatpush3.bf16.msra.mxu1 %v2181_v27  ;;  %2048 = vmatprep.subr.bf16.mxu0 %v2182_v28 }
  0x28   : > { %2070 = vmatprep.subr.bf16.mxu1 %v2183_v29 }
  0x2a   : > { %2049 = vmatpush3.bf16.msra.mxu0 %v2184_v30 }
  0x2b   : > { %2071 = vmatpush3.bf16.msra.mxu1 %v2185_v31  ;;  %2078 = vmatprep.subr.bf16.mxu0 %v2190_v38  ;;  %v2249_v38 = vld [vmem:[%s2870_s3 + $0x24] ss:$8 sps:$4 sm:$0xff]  }
  0x2c   : > { %903 = vmatprep.subr.bf16.mxu1 %v2210_v58  ;;  %v2279_v58 = vld [vmem:[%s2870_s3 + $0x84] ss:$8 sps:$4 sm:$0xff]  }
  0x2d   : > { %719 = vmatmul.mubr.bf16.vlgmr.msra.gmra.mxu0 %v1882_v34  ;;  %v2243_v34 = vld [vmem:[%s2870_s3 + $0x44] ss:$8 sps:$4 sm:$0xff]  }
  0x2e   : > { %759 = vmatmul.mubr.bf16.vlgmr.msra.gmra.mxu1 %v1884_v36  ;;  %2079 = vmatpush3.bf16.msra.mxu0 %v2191_v39  ;;  %v2246_v36 = vld [vmem:[%s2870_s3 + $0x34] ss:$8 sps:$4 sm:$0xff]   ;;  %v2247_v39 = vld [vmem:[%s2870_s3 + $0x20] ss:$8 sps:$4 sm:$0xff]  }
  0x2f   : > { %2080 = vmatprep.subr.bf16.mxu0 %v2192_v40  ;;  %798 = vmatprep.mubr.bf16.mxu0 %v1887_v50  ;;  %v2252_v40 = vld [vmem:[%s2870_s3 + $0x14] ss:$8 sps:$4 sm:$0xff]   ;;  %v2267_v50 = vld [vmem:[%s2870_s3 + $0xc4] ss:$8 sps:$4 sm:$0xff]  }
  0x30   : > { %904 = vmatpush1.bf16.msra.mxu1 %v2208_v57  ;;  %935 = vmatprep.mubr.bf16.mxu1 %v2362_v9  ;;  %v2274_v57 = vld [vmem:[%s2870_s3 + $0x90] ss:$8 sps:$4 sm:$0xff]  }
  0x31   : > { %905 = vmatprep.subr.bf16.mxu1 %v2213_v59  ;;  %v2277_v59 = vld [vmem:[%s2870_s3 + $0x80] ss:$8 sps:$4 sm:$0xff]  }
  0x32   : > { %2081 = vmatpush3.bf16.msra.mxu0 %v2193_v41  ;;  %v2250_v41 = vld [vmem:[%s2870_s3 + $0x10] ss:$8 sps:$4 sm:$0xff]  }
  0x33   : > { %2082 = vmatprep.subr.bf16.mxu0 %v2194_v42  ;;  %v2255_v42 = vld [vmem:[%s2870_s3 + $0x4] ss:$8 sps:$4 sm:$0xff]  }
  0x34   : > { %906 = vmatpush1.bf16.msra.mxu1 %v2211_v60 }
  0x35   : > { %907 = vmatprep.subr.bf16.mxu1 %v2216_v61 }
  0x36   : > { %2083 = vmatpush3.bf16.msra.mxu0 %v2195_v43  ;;  %v2253_v43 = vld [vmem:[%s2870_s3] ss:$8 sps:$4 sm:$0xff]  }
  0x37   : > { %2084 = vmatprep.subr.bf16.mxu0 %v2196_v44  ;;  %v2258_v44 = vld [vmem:[%s2870_s3 + $0xf4] ss:$8 sps:$4 sm:$0xff]  }
  0x38   : > { %908 = vmatpush1.bf16.msra.mxu1 %v2214_v62 }
  0x39   : > { %909 = vmatprep.subr.bf16.mxu1 %v2219_v63 }
  0x3a   : > { %2085 = vmatpush3.bf16.msra.mxu0 %v2197_v45  ;;  %v2256_v45 = vld [vmem:[%s2870_s3 + $0xf0] ss:$8 sps:$4 sm:$0xff]  }
  0x3b   : > { %2086 = vmatprep.subr.bf16.mxu0 %v2198_v46  ;;  %v2261_v46 = vld [vmem:[%s2870_s3 + $0xe4] ss:$8 sps:$4 sm:$0xff]  }
  0x3c   : > { %910 = vmatpush1.bf16.msra.mxu1 %v2217_v0 }
  0x3d   : > { %911 = vmatprep.subr.bf16.mxu1 %v2222_v1 }
  0x3e   : > { %2087 = vmatpush3.bf16.msra.mxu0 %v2199_v47  ;;  %v2259_v47 = vld [vmem:[%s2870_s3 + $0xe0] ss:$8 sps:$4 sm:$0xff]  }
  0x3f   : > { %2088 = vmatprep.subr.bf16.mxu0 %v2200_v49  ;;  %v2262_v49 = vld [vmem:[%s2870_s3 + $0xd0] ss:$8 sps:$4 sm:$0xff]  }
  0x40   : > { %912 = vmatpush1.bf16.msra.mxu1 %v2220_v2 }
  0x41   : > { %913 = vmatprep.subr.bf16.mxu1 %v2225_v3 }
  0x42   : > { %2089 = vmatpush3.bf16.msra.mxu0 %v2201_v51  ;;  %v2265_v51 = vld [vmem:[%s2870_s3 + $0xc0] ss:$8 sps:$4 sm:$0xff]  }
  0x43   : > { %2090 = vmatprep.subr.bf16.mxu0 %v2202_v52  ;;  %v2270_v52 = vld [vmem:[%s2870_s3 + $0xb4] ss:$8 sps:$4 sm:$0xff]  }
  0x44   : > { %914 = vmatpush1.bf16.msra.mxu1 %v2223_v4 }
  0x45   : > { %915 = vmatprep.subr.bf16.mxu1 %v2228_v5 }
  0x46   : > { %2091 = vmatpush3.bf16.msra.mxu0 %v2203_v53  ;;  %v2268_v53 = vld [vmem:[%s2870_s3 + $0xb0] ss:$8 sps:$4 sm:$0xff]  }
  0x47   : > { %2092 = vmatprep.subr.bf16.mxu0 %v2204_v54  ;;  %v2273_v54 = vld [vmem:[%s2870_s3 + $0xa4] ss:$8 sps:$4 sm:$0xff]  }
  0x48   : > { %916 = vmatpush1.bf16.msra.mxu1 %v2226_v6 }
  0x49   : > { %917 = vmatprep.subr.bf16.mxu1 %v2231_v7 }
  0x4a   : > { %2093 = vmatpush3.bf16.msra.mxu0 %v2205_v55  ;;  %v2271_v55 = vld [vmem:[%s2870_s3 + $0xa0] ss:$8 sps:$4 sm:$0xff]  }
  0x4b   : > { %1178 = vmatprep.subr.bf16.mxu0 %v2234_v11 }
  0x4c   : > { %918 = vmatpush1.bf16.msra.mxu1 %v2229_v8 }
  0x4d   : > { %799 = vmatmul.mubr.bf16.vlgmr.msra.gmra.mxu0 %v1886_v56  ;;  %v2276_v56 = vld [vmem:[%s2870_s3 + $0x94] ss:$8 sps:$4 sm:$0xff]  }
  0x4e   : > { %1179 = vmatpush1.bf16.msra.mxu0 %v2232_v10 }
  0x4f   : > { %1180 = vmatprep.subr.bf16.mxu0 %v2237_v12 }
  0x52   : > { %1181 = vmatpush1.bf16.msra.mxu0 %v2235_v13 }
  0x53   : > { %1182 = vmatprep.subr.bf16.mxu0 %v2240_v32 }
  0x56   : > { %1183 = vmatpush1.bf16.msra.mxu0 %v2238_v33 }
  0x57   : > { %1184 = vmatprep.subr.bf16.mxu0 %v2243_v34 }
  0x5a   : > { %1185 = vmatpush1.bf16.msra.mxu0 %v2241_v35 }
  0x5b   : > { %1186 = vmatprep.subr.bf16.mxu0 %v2246_v36 }
  0x5e   : > { %1187 = vmatpush1.bf16.msra.mxu0 %v2244_v37 }
  0x5f   : > { %1188 = vmatprep.subr.bf16.mxu0 %v2249_v38 }
  0x62   : > { %1189 = vmatpush1.bf16.msra.mxu0 %v2247_v39 }
  0x63   : > { %1190 = vmatprep.subr.bf16.mxu0 %v2252_v40 }
  0x66   : > { %1191 = vmatpush1.bf16.msra.mxu0 %v2250_v41 }
  0x67   : > { %1192 = vmatprep.subr.bf16.mxu0 %v2255_v42 }
  0x6a   : > { %1193 = vmatpush1.bf16.msra.mxu0 %v2253_v43  ;;  %v2280_v43 = vld [vmem:[%s2871_s4 + $0x78] sm:$0xff]  }
  0x6b   : > { %1194 = vmatprep.subr.bf16.mxu0 %v2258_v44  ;;  %v2281_v44 = vld [vmem:[%s2871_s4 + $0x38] sm:$0xff]   ;;  %2100 = vmatprep.subr.bf16.mxu1 %v2280_v43 }
  0x6c   : > { %v2296_v43 = vld [vmem:[%s2872_s5 + $0x70] ss:$8 sps:$4 sm:$0xff]  }
  0x6e   : > { %1195 = vmatpush2.bf16.msra.mxu0 %v2256_v45  ;;  %v2282_v45 = vld [vmem:[%s2871_s4 + $0x70] sm:$0xff]  }
  0x6f   : > { %1196 = vmatprep.subr.bf16.mxu0 %v2261_v46  ;;  %v2283_v46 = vld [vmem:[%s2871_s4 + $0x30] sm:$0xff]  }
  0x72   : > { %1197 = vmatpush2.bf16.msra.mxu0 %v2259_v47  ;;  %v2284_v47 = vld [vmem:[%s2871_s4 + $0x68] sm:$0xff]  }
  0x73   : > { %1198 = vmatprep.subr.bf16.mxu0 %v2264_v48  ;;  %v2285_v48 = vld [vmem:[%s2871_s4 + $0x28] sm:$0xff]  }
  0x76   : > { %1199 = vmatpush2.bf16.msra.mxu0 %v2262_v49  ;;  %v2286_v49 = vld [vmem:[%s2871_s4 + $0x60] sm:$0xff]  }
  0x77   : > { %1200 = vmatprep.subr.bf16.mxu0 %v2267_v50  ;;  %v2287_v50 = vld [vmem:[%s2871_s4 + $0x20] sm:$0xff]  }
  0x7a   : > { %1201 = vmatpush2.bf16.msra.mxu0 %v2265_v51  ;;  %v2288_v51 = vld [vmem:[%s2871_s4 + $0x58] sm:$0xff]  }
  0x7b   : > { %1202 = vmatprep.subr.bf16.mxu0 %v2270_v52  ;;  %v2289_v52 = vld [vmem:[%s2871_s4 + $0x18] sm:$0xff]  }
  0x7e   : > { %1203 = vmatpush2.bf16.msra.mxu0 %v2268_v53  ;;  %v2290_v53 = vld [vmem:[%s2871_s4 + $0x50] sm:$0xff]  }
  0x7f   : > { %1204 = vmatprep.subr.bf16.mxu0 %v2273_v54  ;;  %v2291_v54 = vld [vmem:[%s2871_s4 + $0x10] sm:$0xff]  }
  0x82   : > { %1205 = vmatpush2.bf16.msra.mxu0 %v2271_v55  ;;  %v2292_v55 = vld [vmem:[%s2871_s4 + $0x48] sm:$0xff]  }
  0x83   : > { %1206 = vmatprep.subr.bf16.mxu0 %v2276_v56  ;;  %v2293_v56 = vld [vmem:[%s2871_s4 + $0x8] sm:$0xff]  }
  0x86   : > { %1207 = vmatpush2.bf16.msra.mxu0 %v2274_v57  ;;  %v2294_v57 = vld [vmem:[%s2871_s4 + $0x40] sm:$0xff]  }
  0x87   : > { %1208 = vmatprep.subr.bf16.mxu0 %v2279_v58  ;;  %v2295_v58 = vld [vmem:[%s2871_s4] sm:$0xff]  }
  0x8a   : > { %1209 = vmatpush2.bf16.msra.mxu0 %v2277_v59 }
  0xed   : > { %v2050_v14 = vpop.f32.mrf.mxu0 }
  0xee   : > { %v2072_v15 = vpop.f32.mrf.mxu1 }
  0xef   : > { %v2051_v16 = vpop.f32.mrf.mxu0 }
  0xf0   : > { %v2073_v17 = vpop.f32.mrf.mxu1  ;;  %v2052_v22 = vadd.f32 %v2051_v16, %v2050_v14 }
  0xf1   : > { %v2053_v18 = vpop.f32.mrf.mxu0  ;;  %v2074_v23 = vadd.f32 %v2073_v17, %v2072_v15 }
  0xf2   : > { %v2075_v19 = vpop.f32.mrf.mxu1 }
  0xf3   : > { %v2054_v20 = vpop.f32.mrf.mxu0  ;;  %v761_v26 = vadd.f32 %v2074_v23, %v2052_v22 }
  0xf4   : > { %v2076_v21 = vpop.f32.mrf.mxu1 }
 0x10d   : > { %v2094_v24 = vpop.f32.mrf.mxu0 }
 0x10f   : > { %v2095_v25 = vpop.f32.mrf.mxu0 }
 0x110   : > { %v2096_v27 = vadd.f32 %v2095_v25, %v2094_v24 }
 0x111   : > { %v2097_v28 = vpop.f32.mrf.mxu0 }
 0x112   : > { %v801_v29 = vadd.f32 %v2096_v27, %v761_v26 }
 0x113   : > { %v2098_v30 = vpop.f32.mrf.mxu0 }
 0x114   : > { %v806_v31 = vpack.c.bf16 %v801_v29, %v801_v29 }
 0x116   : > { %936 = vmatmul.mubr.bf16.vlgmr.msra.gmra.mxu1 %v806_v31 }
 0x117   : > { %2101 = vmatpush3.bf16.msra.mxu1 %v2281_v44  ;;  %v2301_v44 = vld [vmem:[%s2872_s5 + $0x64] ss:$8 sps:$4 sm:$0xff]  }
 0x118   : > { %2102 = vmatprep.subr.bf16.mxu1 %v2282_v45  ;;  %v2299_v45 = vld [vmem:[%s2872_s5 + $0x60] ss:$8 sps:$4 sm:$0xff]  }
 0x11b   : > { %2103 = vmatpush3.bf16.msra.mxu1 %v2283_v46  ;;  %v2302_v46 = vld [vmem:[%s2872_s5 + $0x50] ss:$8 sps:$4 sm:$0xff]  }
 0x11c   : > { %2104 = vmatprep.subr.bf16.mxu1 %v2284_v47  ;;  %v2307_v47 = vld [vmem:[%s2872_s5 + $0x44] ss:$8 sps:$4 sm:$0xff]  }
 0x11f   : > { %2105 = vmatpush3.bf16.msra.mxu1 %v2285_v48  ;;  %v2305_v48 = vld [vmem:[%s2872_s5 + $0x40] ss:$8 sps:$4 sm:$0xff]  }
 0x120   : > { %2106 = vmatprep.subr.bf16.mxu1 %v2286_v49  ;;  %v2310_v49 = vld [vmem:[%s2872_s5 + $0x34] ss:$8 sps:$4 sm:$0xff]  }
 0x123   : > { %2107 = vmatpush3.bf16.msra.mxu1 %v2287_v50  ;;  %v2308_v50 = vld [vmem:[%s2872_s5 + $0x30] ss:$8 sps:$4 sm:$0xff]  }
 0x124   : > { %2108 = vmatprep.subr.bf16.mxu1 %v2288_v51  ;;  %v2313_v51 = vld [vmem:[%s2872_s5 + $0x24] ss:$8 sps:$4 sm:$0xff]  }
 0x127   : > { %2109 = vmatpush3.bf16.msra.mxu1 %v2289_v52  ;;  %v2311_v52 = vld [vmem:[%s2872_s5 + $0x20] ss:$8 sps:$4 sm:$0xff]  }
 0x128   : > { %2110 = vmatprep.subr.bf16.mxu1 %v2290_v53  ;;  %v2316_v53 = vld [vmem:[%s2872_s5 + $0x14] ss:$8 sps:$4 sm:$0xff]  }
 0x12b   : > { %2111 = vmatpush3.bf16.msra.mxu1 %v2291_v54  ;;  %v2314_v54 = vld [vmem:[%s2872_s5 + $0x10] ss:$8 sps:$4 sm:$0xff]  }
 0x12c   : > { %2112 = vmatprep.subr.bf16.mxu1 %v2292_v55  ;;  %v2319_v55 = vld [vmem:[%s2872_s5 + $0x4] ss:$8 sps:$4 sm:$0xff]  }
 0x12f   : > { %2113 = vmatpush3.bf16.msra.mxu1 %v2293_v56  ;;  %v2317_v56 = vld [vmem:[%s2872_s5] ss:$8 sps:$4 sm:$0xff]  }
 0x130   : > { %2114 = vmatprep.subr.bf16.mxu1 %v2294_v57 }
 0x133   : > { %2115 = vmatpush3.bf16.msra.mxu1 %v2295_v58 }
 0x1d6   : > { %v937_v60 = vpop.f32.mrf.mxu1 }
 0x1d7   : > { %v944_v61 = vrot.slane %v937_v60, 4 }
 0x1d8   : > { %v939_v62 = vpop.f32.mrf.mxu1 }
 0x1d9   : > { %v945_v63 = vadd.f32 %v944_v61, %v937_v60  ;;  %v950_v0 = vrot.slane %v939_v62, 4 }
 0x1da   : > { %v941_v1 = vpop.f32.mrf.mxu1 }
 0x1db   : > { %v946_v2 = vrot.slane %v945_v63, 2  ;;  %v951_v3 = vadd.f32 %v950_v0, %v939_v62 }
 0x1dc   : > { %v942_v4 = vpop.f32.mrf.mxu1 }
 0x1dd   : > { %v947_v5 = vadd.f32 %v946_v2, %v945_v63  ;;  %v952_v6 = vrot.slane %v951_v3, 2 }
 0x1df   : > { %v948_v7 = vrot.slane %v947_v5, 1  ;;  %v953_v8 = vadd.f32 %v952_v6, %v951_v3 }
 0x1e1   : > { %v949_v10 = vadd.f32 %v948_v7, %v947_v5  ;;  %v954_v11 = vrot.slane %v953_v8, 1 }
 0x1e3   : > { %v956_v12 = vmul.f32 0.125, %v949_v10  ;;  %v955_v13 = vadd.f32 %v954_v11, %v953_v8 }
 0x1e5   : > { %v958_v14 = vsub.f32 %v937_v60, %v956_v12  ;;  %v957_v15 = vmul.f32 0.125, %v955_v13 }
 0x1e7   : > { %v960_v16 = vmul.f32 %v958_v14, %v958_v14  ;;  %v959_v17 = vsub.f32 %v939_v62, %v957_v15 }
 0x1e9   : > { %v962_v18 = vrot.slane %v960_v16, 4  ;;  %v961_v19 = vmul.f32 %v959_v17, %v959_v17 }
 0x1eb   : > { %v963_v20 = vadd.f32 %v962_v18, %v960_v16  ;;  %v968_v21 = vrot.slane %v961_v19, 4 }
 0x1ed   : > { %v964_v22 = vrot.slane %v963_v20, 2  ;;  %v969_v23 = vadd.f32 %v968_v21, %v961_v19 }
 0x1ef   : > { %v965_v24 = vadd.f32 %v964_v22, %v963_v20  ;;  %v970_v25 = vrot.slane %v969_v23, 2 }
 0x1f1   : > { %v966_v26 = vrot.slane %v965_v24, 1  ;;  %v971_v27 = vadd.f32 %v970_v25, %v969_v23 }
 0x1f3   : > { %v967_v28 = vadd.f32 %v966_v26, %v965_v24  ;;  %v972_v29 = vrot.slane %v971_v27, 1 }
 0x1f5   : > { %v974_v30 = vmul.f32 0.125, %v967_v28  ;;  %v973_v31 = vadd.f32 %v972_v29, %v971_v27 }
 0x1f7   : > { %v976_v32 = vadd.f32 1e-05, %v974_v30  ;;  %v975_v33 = vmul.f32 0.125, %v973_v31 }
 0x1f9   : > { %2336 = vrsqrt.f32 %v976_v32  ;;  %v977_v34 = vadd.f32 1e-05, %v975_v33 }
 0x1fb   : > { %2338 = vrsqrt.f32 %v977_v34 }
 0x206   : > { %v2337_v35 = vpop.eup %2336 }
 0x207   : > { %v980_v36 = vmul.f32 %v2337_v35, %v958_v14 }
 0x208   : > { %v2339_v37 = vpop.eup %2338 }
 0x209   : > { %v981_v38 = vmul.f32 %v2339_v37, %v959_v17  ;;  %v982_v39 = vmax.f32 %v980_v36, 0.0 }
 0x20b   : > { %v983_v40 = vmax.f32 %v981_v38, 0.0  ;;  %v984_v42 = vpack.c.bf16 %v982_v39, %v982_v39 }
 0x20d   : > { %v985_v41 = vpack.c.bf16 %v983_v40, %v983_v40 }
 0x20f   : > { %1210 = vmatprep.mubr.bf16.mxu0 %v985_v41 }
 0x210   : > { %1211 = vmatmul.mubr.bf16.vlgmr.msra.gmra.mxu0 %v984_v42  ;;  %v2298_v42 = vld [vmem:[%s2872_s5 + $0x74] ss:$8 sps:$4 sm:$0xff]  }
 0x211   : > { %1545 = vmatprep.subr.bf16.mxu1 %v2298_v42 }
 0x2d0   : > { %v1212_v59 = vpop.f32.mrf.mxu0 }
 0x2d1   : > { %v1219_v60 = vrot.slane %v1212_v59, 4 }
 0x2d2   : > { %v1214_v61 = vpop.f32.mrf.mxu0 }
 0x2d3   : > { %v1220_v62 = vadd.f32 %v1219_v60, %v1212_v59  ;;  %v1225_v63 = vrot.slane %v1214_v61, 4 }
 0x2d4   : > { %v1216_v0 = vpop.f32.mrf.mxu0 }
 0x2d5   : > { %v1221_v1 = vrot.slane %v1220_v62, 2  ;;  %v1226_v2 = vadd.f32 %v1225_v63, %v1214_v61 }
 0x2d6   : > { %v1217_v3 = vpop.f32.mrf.mxu0 }
 0x2d7   : > { %v1222_v4 = vadd.f32 %v1221_v1, %v1220_v62  ;;  %v1227_v5 = vrot.slane %v1226_v2, 2 }
 0x2d9   : > { %v1223_v6 = vrot.slane %v1222_v4, 1  ;;  %v1228_v7 = vadd.f32 %v1227_v5, %v1226_v2 }
 0x2db   : > { %v1224_v8 = vadd.f32 %v1223_v6, %v1222_v4  ;;  %v1229_v10 = vrot.slane %v1228_v7, 1 }
 0x2dd   : > { %v1231_v11 = vmul.f32 0.125, %v1224_v8  ;;  %v1230_v12 = vadd.f32 %v1229_v10, %v1228_v7 }
 0x2df   : > { %v1233_v13 = vsub.f32 %v1212_v59, %v1231_v11  ;;  %v1232_v14 = vmul.f32 0.125, %v1230_v12 }
 0x2e1   : > { %v1235_v15 = vmul.f32 %v1233_v13, %v1233_v13  ;;  %v1234_v16 = vsub.f32 %v1214_v61, %v1232_v14 }
 0x2e3   : > { %v1237_v17 = vrot.slane %v1235_v15, 4  ;;  %v1236_v18 = vmul.f32 %v1234_v16, %v1234_v16 }
 0x2e5   : > { %v1238_v19 = vadd.f32 %v1237_v17, %v1235_v15  ;;  %v1243_v20 = vrot.slane %v1236_v18, 4 }
 0x2e7   : > { %v1239_v21 = vrot.slane %v1238_v19, 2  ;;  %v1244_v22 = vadd.f32 %v1243_v20, %v1236_v18  ;;  %v2321_v20 = vld [vmem:[%s2873_s6 + $0x38] sm:$0xff]  }
 0x2e9   : > { %v1240_v23 = vadd.f32 %v1239_v21, %v1238_v19  ;;  %v1245_v24 = vrot.slane %v1244_v22, 2  ;;  %v2320_v19 = vld [vmem:[%s2873_s6 + $0x78] sm:$0xff]   ;;  %v2322_v21 = vld [vmem:[%s2873_s6 + $0x70] sm:$0xff]  }
 0x2ea   : > { %2122 = vmatprep.subr.bf16.mxu0 %v2320_v19 }
 0x2eb   : > { %v1241_v25 = vrot.slane %v1240_v23, 1  ;;  %v1246_v26 = vadd.f32 %v1245_v24, %v1244_v22  ;;  %2123 = vmatpush3.bf16.msra.mxu0 %v2321_v20  ;;  %v2323_v22 = vld [vmem:[%s2873_s6 + $0x30] sm:$0xff]   ;;  %v2325_v24 = vld [vmem:[%s2873_s6 + $0x28] sm:$0xff]  }
 0x2ec   : > { %2124 = vmatprep.subr.bf16.mxu0 %v2322_v21 }
 0x2ed   : > { %v1242_v27 = vadd.f32 %v1241_v25, %v1240_v23  ;;  %v1247_v28 = vrot.slane %v1246_v26, 1  ;;  %v2324_v23 = vld [vmem:[%s2873_s6 + $0x68] sm:$0xff]   ;;  %v2326_v25 = vld [vmem:[%s2873_s6 + $0x60] sm:$0xff]  }
 0x2ef   : > { %v1249_v29 = vmul.f32 0.125, %v1242_v27  ;;  %v1248_v30 = vadd.f32 %v1247_v28, %v1246_v26  ;;  %2125 = vmatpush3.bf16.msra.mxu0 %v2323_v22  ;;  %v2327_v26 = vld [vmem:[%s2873_s6 + $0x20] sm:$0xff]   ;;  %v2328_v27 = vld [vmem:[%s2873_s6 + $0x58] sm:$0xff]  }
 0x2f0   : > { %2126 = vmatprep.subr.bf16.mxu0 %v2324_v23  ;;  %v2329_v28 = vld [vmem:[%s2873_s6 + $0x18] sm:$0xff]  }
 0x2f1   : > { %v1251_v31 = vadd.f32 1e-05, %v1249_v29  ;;  %v1250_v32 = vmul.f32 0.125, %v1248_v30  ;;  %v2330_v29 = vld [vmem:[%s2873_s6 + $0x50] sm:$0xff]  }
 0x2f2   : > { %v2331_v30 = vld [vmem:[%s2873_s6 + $0x10] sm:$0xff]  }
 0x2f3   : > { %2340 = vrsqrt.f32 %v1251_v31  ;;  %v1252_v33 = vadd.f32 1e-05, %v1250_v32  ;;  %2127 = vmatpush3.bf16.msra.mxu0 %v2325_v24  ;;  %v2332_v31 = vld [vmem:[%s2873_s6 + $0x48] sm:$0xff]  }
 0x2f4   : > { %2128 = vmatprep.subr.bf16.mxu0 %v2326_v25  ;;  %v2333_v32 = vld [vmem:[%s2873_s6 + $0x8] sm:$0xff]  }
 0x2f5   : > { %2342 = vrsqrt.f32 %v1252_v33  ;;  %v2334_v33 = vld [vmem:[%s2873_s6 + $0x40] sm:$0xff]  }
 0x2f7   : > { %2129 = vmatpush3.bf16.msra.mxu0 %v2327_v26 }
 0x2f8   : > { %2130 = vmatprep.subr.bf16.mxu0 %v2328_v27 }
 0x2fb   : > { %2131 = vmatpush3.bf16.msra.mxu0 %v2329_v28 }
 0x2fc   : > { %2132 = vmatprep.subr.bf16.mxu0 %v2330_v29 }
 0x2ff   : > { %2133 = vmatpush3.bf16.msra.mxu0 %v2331_v30 }
 0x300   : > { %v2341_v34 = vpop.eup %2340  ;;  %2134 = vmatprep.subr.bf16.mxu0 %v2332_v31 }
 0x301   : > { %v1255_v35 = vmul.f32 %v2341_v34, %v1233_v13  ;;  %v2335_v34 = vld [vmem:[%s2873_s6] sm:$0xff]  }
 0x302   : > { %v2343_v36 = vpop.eup %2342 }
 0x303   : > { %v1256_v37 = vmul.f32 %v2343_v36, %v1234_v16  ;;  %v1257_v38 = vmax.f32 %v1255_v35, 0.0  ;;  %2135 = vmatpush3.bf16.msra.mxu0 %v2333_v32 }
 0x304   : > { %2136 = vmatprep.subr.bf16.mxu0 %v2334_v33 }
 0x305   : > { %v1258_v39 = vmax.f32 %v1256_v37, 0.0  ;;  %v1259_v41 = vpack.c.bf16 %v1257_v38, %v1257_v38 }
 0x307   : > { %v1260_v40 = vpack.c.bf16 %v1258_v39, %v1258_v39  ;;  %2137 = vmatpush3.bf16.msra.mxu0 %v2335_v34 }
 0x309   : > { %1421 = vmatprep.mubr.bf16.mxu1 %v1260_v40 }
 0x30a   : > { %1422 = vmatmul.mubr.bf16.vlgmr.msra.gmra.mxu1 %v1259_v41 }
 0x30b   : > { %1577 = vmatprep.mubr.bf16.mxu1 %v2362_v9  ;;  %1546 = vmatpush1.bf16.msra.mxu1 %v2296_v43  ;;  %v2304_v9 = vld [vmem:[%s2872_s5 + $0x54] ss:$8 sps:$4 sm:$0xff]  }
 0x30c   : > { %1547 = vmatprep.subr.bf16.mxu1 %v2301_v44 }
 0x30f   : > { %1548 = vmatpush1.bf16.msra.mxu1 %v2299_v45 }
 0x310   : > { %1549 = vmatprep.subr.bf16.mxu1 %v2304_v9 }
 0x313   : > { %1550 = vmatpush1.bf16.msra.mxu1 %v2302_v46 }
 0x314   : > { %1551 = vmatprep.subr.bf16.mxu1 %v2307_v47 }
 0x317   : > { %1552 = vmatpush1.bf16.msra.mxu1 %v2305_v48 }
 0x318   : > { %1553 = vmatprep.subr.bf16.mxu1 %v2310_v49 }
 0x31b   : > { %1554 = vmatpush1.bf16.msra.mxu1 %v2308_v50 }
 0x31c   : > { %1555 = vmatprep.subr.bf16.mxu1 %v2313_v51 }
 0x31f   : > { %1556 = vmatpush1.bf16.msra.mxu1 %v2311_v52 }
 0x320   : > { %1557 = vmatprep.subr.bf16.mxu1 %v2316_v53 }
 0x323   : > { %1558 = vmatpush1.bf16.msra.mxu1 %v2314_v54 }
 0x324   : > { %1559 = vmatprep.subr.bf16.mxu1 %v2319_v55 }
 0x327   : > { %1560 = vmatpush1.bf16.msra.mxu1 %v2317_v56 }
 0x3ca   : > { %v2116_v57 = vpop.f32.mrf.mxu1 }
 0x3cc   : > { %v2117_v58 = vpop.f32.mrf.mxu1 }
 0x3cd   : > { %v2118_v59 = vadd.f32 %v2117_v58, %v2116_v57 }
 0x3ce   : > { %v2119_v60 = vpop.f32.mrf.mxu1 }
 0x3cf   : > { %v1429_v61 = vrot.slane %v2118_v59, 4 }
 0x3d0   : > { %v2120_v62 = vpop.f32.mrf.mxu1 }
 0x3d1   : > { %v1430_v63 = vadd.f32 %v2118_v59, %v1429_v61 }
 0x3d3   : > { %v1431_v0 = vrot.slane %v1430_v63, 2 }
 0x3d5   : > { %v1432_v1 = vadd.f32 %v1431_v0, %v1430_v63 }
 0x3d7   : > { %v1433_v2 = vrot.slane %v1432_v1, 1 }
 0x3d9   : > { %v1434_v3 = vadd.f32 %v1433_v2, %v1432_v1 }
 0x3db   : > { %v1435_v4 = vmul.f32 0.125, %v1434_v3 }
 0x3dd   : > { %v1436_v5 = vsub.f32 %v2118_v59, %v1435_v4 }
 0x3df   : > { %v1437_v6 = vmul.f32 %v1436_v5, %v1436_v5 }
 0x3e1   : > { %v1438_v7 = vrot.slane %v1437_v6, 4 }
 0x3e3   : > { %v1439_v8 = vadd.f32 %v1438_v7, %v1437_v6 }
 0x3e5   : > { %v1440_v10 = vrot.slane %v1439_v8, 2 }
 0x3e7   : > { %v1441_v11 = vadd.f32 %v1440_v10, %v1439_v8 }
 0x3e9   : > { %v1442_v12 = vrot.slane %v1441_v11, 1 }
 0x3eb   : > { %v1443_v13 = vadd.f32 %v1442_v12, %v1441_v11 }
 0x3ed   : > { %v1444_v14 = vmul.f32 0.125, %v1443_v13 }
 0x3ef   : > { %v1445_v15 = vadd.f32 1e-05, %v1444_v14 }
 0x3f1   : > { %2344 = vrsqrt.f32 %v1445_v15 }
 0x3fe   : > { %v2345_v16 = vpop.eup %2344 }
 0x3ff   : > { %v1447_v17 = vmul.f32 %v2345_v16, %v1436_v5 }
 0x401   : > { %v1448_v18 = vpack.c.bf16 %v1447_v17, %v1447_v17 }
 0x403   : > { %1578 = vmatmul.mubr.bf16.vlgmr.msra.gmra.mxu1 %v1448_v18 }
 0x4c3   : > { %v1579_v35 = vpop.f32.mrf.mxu1 }
 0x4c4   : > { %v1586_v36 = vrot.slane %v1579_v35, 4 }
 0x4c5   : > { %v1581_v37 = vpop.f32.mrf.mxu1 }
 0x4c6   : > { %v1587_v38 = vadd.f32 %v1586_v36, %v1579_v35  ;;  %v1592_v39 = vrot.slane %v1581_v37, 4 }
 0x4c7   : > { %v1583_v40 = vpop.f32.mrf.mxu1 }
 0x4c8   : > { %v1588_v41 = vrot.slane %v1587_v38, 2  ;;  %v1593_v42 = vadd.f32 %v1592_v39, %v1581_v37 }
 0x4c9   : > { %v1584_v43 = vpop.f32.mrf.mxu1 }
 0x4ca   : > { %v1589_v44 = vadd.f32 %v1588_v41, %v1587_v38  ;;  %v1594_v45 = vrot.slane %v1593_v42, 2 }
 0x4cc   : > { %v1590_v9 = vrot.slane %v1589_v44, 1  ;;  %v1595_v46 = vadd.f32 %v1594_v45, %v1593_v42 }
 0x4ce   : > { %v1591_v47 = vadd.f32 %v1590_v9, %v1589_v44  ;;  %v1596_v48 = vrot.slane %v1595_v46, 1 }
 0x4d0   : > { %v1598_v49 = vmul.f32 0.125, %v1591_v47  ;;  %v1597_v50 = vadd.f32 %v1596_v48, %v1595_v46 }
 0x4d2   : > { %v1600_v51 = vsub.f32 %v1579_v35, %v1598_v49  ;;  %v1599_v52 = vmul.f32 0.125, %v1597_v50 }
 0x4d4   : > { %v1602_v53 = vmul.f32 %v1600_v51, %v1600_v51  ;;  %v1601_v54 = vsub.f32 %v1581_v37, %v1599_v52 }
 0x4d6   : > { %v1604_v55 = vrot.slane %v1602_v53, 4  ;;  %v1603_v56 = vmul.f32 %v1601_v54, %v1601_v54 }
 0x4d8   : > { %v1605_v57 = vadd.f32 %v1604_v55, %v1602_v53  ;;  %v1610_v58 = vrot.slane %v1603_v56, 4 }
 0x4da   : > { %v1606_v59 = vrot.slane %v1605_v57, 2  ;;  %v1611_v60 = vadd.f32 %v1610_v58, %v1603_v56 }
 0x4dc   : > { %v1607_v61 = vadd.f32 %v1606_v59, %v1605_v57  ;;  %v1612_v62 = vrot.slane %v1611_v60, 2 }
 0x4de   : > { %v1608_v63 = vrot.slane %v1607_v61, 1  ;;  %v1613_v0 = vadd.f32 %v1612_v62, %v1611_v60 }
 0x4e0   : > { %v1609_v1 = vadd.f32 %v1608_v63, %v1607_v61  ;;  %v1614_v2 = vrot.slane %v1613_v0, 1 }
 0x4e2   : > { %v1616_v3 = vmul.f32 0.125, %v1609_v1  ;;  %v1615_v4 = vadd.f32 %v1614_v2, %v1613_v0 }
 0x4e4   : > { %v1618_v5 = vadd.f32 1e-05, %v1616_v3  ;;  %v1617_v6 = vmul.f32 0.125, %v1615_v4 }
 0x4e6   : > { %2346 = vrsqrt.f32 %v1618_v5  ;;  %v1619_v7 = vadd.f32 1e-05, %v1617_v6 }
 0x4e8   : > { %2348 = vrsqrt.f32 %v1619_v7 }
 0x4f3   : > { %v2347_v8 = vpop.eup %2346 }
 0x4f4   : > { %v1622_v10 = vmul.f32 %v2347_v8, %v1600_v51 }
 0x4f5   : > { %v2349_v11 = vpop.eup %2348 }
 0x4f6   : > { %v1623_v12 = vmul.f32 %v2349_v11, %v1601_v54  ;;  %v1624_v13 = vmax.f32 %v1622_v10, 0.0 }
 0x4f8   : > { %v1625_v14 = vmax.f32 %v1623_v12, 0.0  ;;  %v1626_v16 = vpack.c.bf16 %v1624_v13, %v1624_v13 }
 0x4fa   : > { %v1627_v15 = vpack.c.bf16 %v1625_v14, %v1625_v14 }
 0x4fc   : > { %1788 = vmatprep.mubr.bf16.mxu0 %v1627_v15 }
 0x4fd   : > { %1789 = vmatmul.mubr.bf16.vlgmr.msra.gmra.mxu0 %v1626_v16 }
 0x5bd   : > { %v2138_v17 = vpop.f32.mrf.mxu0 }
 0x5bf   : > { %v2139_v18 = vpop.f32.mrf.mxu0 }
 0x5c0   : > { %v2140_v19 = vadd.f32 %v2139_v18, %v2138_v17 }
 0x5c1   : > { %v2141_v20 = vpop.f32.mrf.mxu0 }
 0x5c2   : > { %v1796_v21 = vrot.slane %v2140_v19, 4 }
 0x5c3   : > { %v2142_v22 = vpop.f32.mrf.mxu0 }
 0x5c4   : > { %v1797_v23 = vadd.f32 %v2140_v19, %v1796_v21 }
 0x5c6   : > { %v1798_v24 = vrot.slane %v1797_v23, 2 }
 0x5c8   : > { %v1799_v25 = vadd.f32 %v1798_v24, %v1797_v23 }
 0x5ca   : > { %v1800_v26 = vrot.slane %v1799_v25, 1 }
 0x5cc   : > { %v1801_v27 = vadd.f32 %v1800_v26, %v1799_v25 }
 0x5ce   : > { %v1802_v28 = vmul.f32 0.125, %v1801_v27 }
 0x5d0   : > { %v1803_v29 = vsub.f32 %v2140_v19, %v1802_v28 }
 0x5d2   : > { %v1804_v30 = vmul.f32 %v1803_v29, %v1803_v29 }
 0x5d4   : > { %v1805_v31 = vrot.slane %v1804_v30, 4 }
 0x5d6   : > { %v1806_v32 = vadd.f32 %v1805_v31, %v1804_v30 }
 0x5d8   : > { %v1807_v33 = vrot.slane %v1806_v32, 2 }
 0x5da   : > { %v1808_v34 = vadd.f32 %v1807_v33, %v1806_v32 }
 0x5dc   : > { %v1809_v35 = vrot.slane %v1808_v34, 1 }
 0x5de   : > { %v1810_v36 = vadd.f32 %v1809_v35, %v1808_v34 }
 0x5e0   : > { %v1811_v37 = vmul.f32 0.125, %v1810_v36 }
 0x5e2   : > { %v1812_v38 = vadd.f32 1e-05, %v1811_v37 }
 0x5e4   : > { %2350 = vrsqrt.f32 %v1812_v38 }
 0x5f1   : > { %v2351_v39 = vpop.eup %2350 }
 0x5f2   : > { %v1814_v40 = vmul.f32 %v2351_v39, %v1803_v29 }
 0x5f4   : > { %v1815_v41 = vmul.f32 %v1814_v40, %v1814_v40 }
 0x5f6   : > { %1816 = vadd.xlane.f32.xlu0 %v1815_v41 }
 0x67f   : > { %v1817_v42 = vpop.xlane.xlu0 %1816 }
 0x680   : > { %v1818_v43 = vmax.f32 %v1817_v42, 1e-24 }
 0x682   : > { %2352 = vrsqrt.f32 %v1818_v43 }
 0x68f   : > { %v2353_v44 = vpop.eup %2352 }
 0x690   : > { %v1820_v45 = vmul.f32 %v2353_v44, %v1814_v40 }
 0x692   : > { %1821 = vst [vmem:[%s276_s28] sm:$0xff] %v1820_v45 }
 0x693 PF: > { %s17_s24 = sadd.s32 1, %s2360_s24  }
 0x694   : > { %p14_p4 = scmp.ge.s32.totalorder %s17_s24, 4  }
 0x696   :  { %16 = sbr.rel (!%p14_p4) target bundleno = 1 (0x1), region = 78 }

</bundles_post_ra>
